<compile_context>
chip_gen: v7x
topology: tpu7x:2x2x1
jax: 0.10.0
libtpu: 0.0.40
codegen_flags: <defaults>
</compile_context>

<pallas_src>
import jax
import jax.numpy as jnp
from jax.experimental import pallas as pl
from jax.experimental.pallas import tpu as pltpu


# ----------------------------------------------------------------------------
# Fused conv (+ bias + ReLU) kernel: space-to-depth phases + flat-shift taps
# ----------------------------------------------------------------------------

def _make_conv_kernel(kh, kw, stride, wq, L, cout):
    """Kernel for a kh x kw, stride-`stride` conv on space-to-depth phases.

    x_ref : (stride*stride, Hq*Wq, Cin)  bf16  phase planes, flattened spatial
    w_ref : (kh*kw, Cin, Cout)           bf16  tap-major weights
    b_ref : (1, Cout)                    f32
    o_ref : (L, Cout)                    bf16  L = Ho*Wq (halo cols dropped outside)
    """

    def kernel(x_ref, w_ref, b_ref, o_ref):
        acc = jnp.zeros((L, cout), jnp.float32)
        for ky in range(kh):
            dy, ay = divmod(ky, stride)          # padded row = stride*(oy+dy) + ay
            for kx in range(kw):
                dx, ax = divmod(kx, stride)
                phase = ay * stride + ax
                off = dy * wq + dx               # flat shift inside the phase plane
                a_tap = x_ref[phase, off:off + L, :]          # (L, Cin) bf16
                acc = acc + jnp.dot(a_tap, w_ref[ky * kw + kx],
                                    preferred_element_type=jnp.float32)
        o_ref[...] = jnp.maximum(acc + b_ref[...], 0.0).astype(o_ref.dtype)

    return kernel


def conv_relu_fused(x_nhwc, w_taps, b, *, kh, kw, stride, pad):
    """ReLU(conv2d(x, w, stride=stride, padding=pad)), fused in one Pallas kernel.

    The zero-padded input is rearranged (one wrapper-side XLA pass) into the
    stride*stride phase planes; no im2col matrix ever touches HBM.
    """
    n, h, w_in, cin = x_nhwc.shape
    cout = w_taps.shape[-1]
    ho = (h + 2 * pad - kh) // stride + 1
    wo = (w_in + 2 * pad - kw) // stride + 1
    dy_max = (kh - 1) // stride
    dx_max = (kw - 1) // stride
    hq = ho + dy_max + 1          # one extra phase row keeps flat-shift reads in range
    wq = wo + dx_max
    hp, wp = stride * hq, stride * wq
    assert hp >= h + pad and wp >= w_in + pad

    xp = jnp.pad(x_nhwc.astype(jnp.bfloat16),
                 ((0, 0), (pad, hp - h - pad), (pad, wp - w_in - pad), (0, 0)))
    x4 = xp.reshape(n, hq, stride, wq, stride, cin)
    x4 = x4.transpose(0, 2, 4, 1, 3, 5).reshape(n, stride * stride, hq * wq, cin)

    L = ho * wq
    kernel = _make_conv_kernel(kh, kw, stride, wq, L, cout)
    cost = pl.CostEstimate(
        flops=2 * n * L * kh * kw * cin * cout,
        transcendentals=0,
        bytes_accessed=x4.size * 2 + w_taps.size * 2 + n * L * cout * 2 + cout * 4,
    )
    # TODO(synk): for very large spatial inputs, add output-row tiling with a
    # manual halo DMA; here one phase-plane block per batch element fits VMEM.
    out = pl.pallas_call(
        kernel,
        out_shape=jax.ShapeDtypeStruct((n, L, cout), jnp.bfloat16),
        grid_spec=pltpu.PrefetchScalarGridSpec(
            num_scalar_prefetch=0,
            grid=(n,),
            in_specs=[
                pl.BlockSpec((None, stride * stride, hq * wq, cin),
                             lambda i: (i, 0, 0, 0)),
                pl.BlockSpec((kh * kw, cin, cout), lambda i: (0, 0, 0)),
                pl.BlockSpec((1, cout), lambda i: (0, 0)),
            ],
            out_specs=pl.BlockSpec((None, L, cout), lambda i: (i, 0, 0)),
        ),
        compiler_params=pltpu.CompilerParams(
            dimension_semantics=("parallel",),
            vmem_limit_bytes=32 * 1024 * 1024),
        cost_estimate=cost,
    )(x4, w_taps, b.reshape(1, cout).astype(jnp.float32))
    # Drop the dx halo column(s) carried through the flat-offset accumulation.
    return out.reshape(n, ho, wq, cout)[:, :, :wo, :]


# ----------------------------------------------------------------------------
# K-tiled GEMM + bias + ReLU (fc layer)
# ----------------------------------------------------------------------------

def _gemm_bias_relu_kernel(a_ref, w_ref, b_ref, o_ref, acc_ref):
    k = pl.program_id(1)

    @pl.when(k == 0)
    def _init():
        acc_ref[...] = jnp.zeros_like(acc_ref)

    acc_ref[...] += jnp.dot(a_ref[...], w_ref[...],
                            preferred_element_type=jnp.float32)

    @pl.when(k == pl.num_programs(1) - 1)
    def _finalize():
        o_ref[...] = jnp.maximum(acc_ref[...] + b_ref[...], 0.0).astype(o_ref.dtype)


def gemm_bias_relu(a, w, b, *, tm_max=256, tk_max=512):
    """ReLU(a @ w + b); a:(M,K), w:(K,N), b:(N,). bf16 operands, f32 accumulate."""
    M, K = a.shape
    K2, N = w.shape
    assert K == K2
    tm = M if M <= tm_max else tm_max
    m_pad = pl.cdiv(M, tm) * tm
    tk = K if K <= tk_max else tk_max
    k_pad = pl.cdiv(K, tk) * tk
    n_pad = pl.cdiv(N, 128) * 128

    a_p = a.astype(jnp.bfloat16)
    if (m_pad, k_pad) != (M, K):
        a_p = jnp.pad(a_p, ((0, m_pad - M), (0, k_pad - K)))
    w_p = w.astype(jnp.bfloat16)
    if (k_pad, n_pad) != (K, N):
        w_p = jnp.pad(w_p, ((0, k_pad - K), (0, n_pad - N)))
    b_p = b.astype(jnp.float32)
    if n_pad != N:
        b_p = jnp.pad(b_p, (0, n_pad - N))

    cost = pl.CostEstimate(
        flops=2 * m_pad * k_pad * n_pad,
        transcendentals=0,
        bytes_accessed=(m_pad * k_pad + k_pad * n_pad) * 2
                       + m_pad * n_pad * 4 + n_pad * 4,
    )
    out = pl.pallas_call(
        _gemm_bias_relu_kernel,
        out_shape=jax.ShapeDtypeStruct((m_pad, n_pad), jnp.float32),
        grid_spec=pltpu.PrefetchScalarGridSpec(
            num_scalar_prefetch=0,
            grid=(m_pad // tm, k_pad // tk),
            in_specs=[
                pl.BlockSpec((tm, tk), lambda i, k: (i, k)),      # A tile
                pl.BlockSpec((tk, n_pad), lambda i, k: (k, 0)),   # W tile (K-tiled)
                pl.BlockSpec((1, n_pad), lambda i, k: (0, 0)),    # bias (resident)
            ],
            out_specs=pl.BlockSpec((tm, n_pad), lambda i, k: (i, 0)),
            scratch_shapes=[pltpu.VMEM((tm, n_pad), jnp.float32)],
        ),
        compiler_params=pltpu.CompilerParams(
            dimension_semantics=("parallel", "arbitrary"),
            vmem_limit_bytes=32 * 1024 * 1024),
        cost_estimate=cost,
    )(a_p, w_p, b_p.reshape(1, n_pad))
    return out[:M, :N]


# ----------------------------------------------------------------------------
# SharedCNN model (deterministic in-script parameter init)
# ----------------------------------------------------------------------------

class SharedCNNPallas:
    def __init__(self, input_channels, spatial_hw, train, key):
        self.train = train
        ks = jax.random.split(key, 10)

        def conv_params(kw_, kb, cin, cout):
            fan_in = 9 * cin
            w = jax.random.normal(kw_, (3, 3, cin, cout), jnp.float32) / jnp.sqrt(fan_in)
            b = 0.01 * jax.random.normal(kb, (cout,), jnp.float32)
            return w, b

        self.w1, self.b1 = conv_params(ks[0], ks[1], input_channels, 32)
        self.w2, self.b2 = conv_params(ks[2], ks[3], 32, 64)
        self.w3, self.b3 = conv_params(ks[4], ks[5], 64, 128)
        self.w4, self.b4 = conv_params(ks[6], ks[7], 128, 256)

        # AvgPool2d(2,2) folded into conv1: 3x3/s2/p1 on the pooled tensor ==
        # 6x6/s4/p2 on the raw input with each tap replicated 2x2, scaled 0.25.
        w1_6x6 = 0.25 * jnp.repeat(jnp.repeat(self.w1, 2, axis=0), 2, axis=1)
        self.w1_taps = w1_6x6.reshape(36, input_channels, 32).astype(jnp.bfloat16)
        self.w2_taps = self.w2.reshape(9, 32, 64).astype(jnp.bfloat16)
        self.w3_taps = self.w3.reshape(9, 64, 128).astype(jnp.bfloat16)
        self.w4_taps = self.w4.reshape(9, 128, 256).astype(jnp.bfloat16)

        # Spatial size after avgpool(2,2) + 4x (k=3, stride-2, pad-1) convs.
        h, w = spatial_hw
        h, w = h // 2, w // 2
        for _ in range(4):
            h = (h - 1) // 2 + 1
            w = (w - 1) // 2 + 1
        in_features = 256 * h * w
        # TODO(synk): reference hard-codes fc in_features = 256*34*60 (a ~(C,1088,1920)
        # input); the fc here is sized from the actual test spatial dims instead.
        self.fc_w = (jax.random.normal(ks[8], (in_features, 128), jnp.float32)
                     / jnp.sqrt(in_features))
        self.fc_b = 0.01 * jax.random.normal(ks[9], (128,), jnp.float32)

    def __call__(self, x_nchw):
        # TODO(synk): torch.from_numpy / isinstance dispatch of the reference is
        # host-side glue; any array-like is coerced to a float32 jnp array here.
        x = jnp.asarray(x_nchw, jnp.float32)
        n, c, h, w = x.shape
        assert h % 2 == 0 and w % 2 == 0, "pool+conv1 fold assumes even spatial dims"
        x = jnp.transpose(x, (0, 2, 3, 1))                     # NCHW -> NHWC
        # avgpool(2,2) + F.relu(conv1): one fused 6x6/stride-4/pad-2 conv kernel.
        x = conv_relu_fused(x, self.w1_taps, self.b1, kh=6, kw=6, stride=4, pad=2)
        x = conv_relu_fused(x, self.w2_taps, self.b2, kh=3, kw=3, stride=2, pad=1)
        x = conv_relu_fused(x, self.w3_taps, self.b3, kh=3, kw=3, stride=2, pad=1)
        x = conv_relu_fused(x, self.w4_taps, self.b4, kh=3, kw=3, stride=2, pad=1)
        # nn.Flatten on NCHW flattens per-sample in (C, H, W) order.
        x = jnp.transpose(x, (0, 3, 1, 2)).reshape(x.shape[0], -1)
        if not self.train:
            x = x.reshape(1, -1)                               # x.view(1, -1)
        x = gemm_bias_relu(x, self.fc_w, self.fc_b)            # F.relu(self.fc(x))
        if x.shape[0] == 1:                                    # torch .squeeze(0)
            x = jnp.squeeze(x, axis=0)
        return x


# ----------------------------------------------------------------------------
# Pure-JAX reference (f32) for a numerical sanity check
# ----------------------------------------------------------------------------

def reference_forward(model, x_nchw):
    x = jnp.asarray(x_nchw, jnp.float32)
    x = jnp.transpose(x, (0, 2, 3, 1))
    x = 0.25 * (x[:, 0::2, 0::2, :] + x[:, 0::2, 1::2, :] +
                x[:, 1::2, 0::2, :] + x[:, 1::2, 1::2, :])
    for w, b in ((model.w1, model.b1), (model.w2, model.b2),
                 (model.w3, model.b3), (model.w4, model.b4)):
        x = jax.lax.conv_general_dilated(
            x, w, window_strides=(2, 2), padding=((1, 1), (1, 1)),
            dimension_numbers=("NHWC", "HWIO", "NHWC"))
        x = jnp.maximum(x + b, 0.0)
    x = jnp.transpose(x, (0, 3, 1, 2)).reshape(x.shape[0], -1)
    if not model.train:
        x = x.reshape(1, -1)
    x = jnp.maximum(x @ model.fc_w + model.fc_b, 0.0)
    if x.shape[0] == 1:
        x = jnp.squeeze(x, axis=0)
    return x


# ----------------------------------------------------------------------------

if __name__ == "__main__":
    key = jax.random.PRNGKey(0)
    k_x, k_p = jax.random.split(key)

    batch, cin, H, W = 2, 4, 16, 16
    x = jax.random.normal(k_x, (batch, cin, H, W), jnp.float32)

    model = SharedCNNPallas(input_channels=cin, spatial_hw=(H, W),
                            train=True, key=k_p)
    out = jax.block_until_ready(model(x))

    assert out.shape == (batch, 128), out.shape
    assert bool(jnp.all(jnp.isfinite(out)))

    ref = jax.block_until_ready(reference_forward(model, x))
    assert bool(jnp.allclose(out, ref, rtol=5e-2, atol=5e-2)), (
        "max abs diff vs reference: %f" % float(jnp.max(jnp.abs(out - ref))))

    print("KERNEL_OK")
</pallas_src>

<mosaic_0001>
module attributes {stable_mosaic.version = 11 : i64} {
  func.func @kernel(%arg0: i32, %arg1: memref<1x16x30x4xbf16, #tpu.memory_space<vmem>>, %arg2: memref<36x4x32xbf16, #tpu.memory_space<vmem>>, %arg3: memref<1x32xf32, #tpu.memory_space<vmem>>, %arg4: memref<1x20x32xbf16, #tpu.memory_space<vmem>>) attributes {dimension_semantics = [#tpu.dimension_semantics<parallel>], iteration_bounds = array<i64: 2>, scalar_prefetch = 0 : i64, scratch_operands = 0 : i64, tpu.core_type = #tpu.core_type<tc>, window_params = [{transform_indices = @transform_0, window_bounds = array<i64: 1, 16, 30, 4>}, {pipeline_mode = #tpu.pipeline_mode<synchronous>, transform_indices = @transform_1, window_bounds = array<i64: 36, 4, 32>}, {pipeline_mode = #tpu.pipeline_mode<synchronous>, transform_indices = @transform_2, window_bounds = array<i64: 1, 32>}, {transform_indices = @transform_3, window_bounds = array<i64: 1, 20, 32>}]} {
    %cst = arith.constant 0.000000e+00 : f32
    %0 = vector.broadcast %cst : f32 to vector<20x32xf32>
    %c0 = arith.constant 0 : index
    %c0_0 = arith.constant 0 : index
    %c0_1 = arith.constant 0 : index
    %c0_2 = arith.constant 0 : index
    %1 = vector.load %arg1[%c0, %c0_0, %c0_1, %c0_2] : memref<1x16x30x4xbf16, #tpu.memory_space<vmem>>, vector<1x1x20x4xbf16>
    %2 = vector.shape_cast %1 : vector<1x1x20x4xbf16> to vector<20x4xbf16>
    %c0_3 = arith.constant 0 : index
    %c0_4 = arith.constant 0 : index
    %c0_5 = arith.constant 0 : index
    %3 = vector.load %arg2[%c0_3, %c0_4, %c0_5] : memref<36x4x32xbf16, #tpu.memory_space<vmem>>, vector<1x4x32xbf16>
    %4 = vector.shape_cast %3 : vector<1x4x32xbf16> to vector<4x32xbf16>
    %cst_6 = arith.constant dense<0.000000e+00> : vector<20x32xf32>
    %5 = tpu.matmul %2, %4, %cst_6 {dimension_numbers = #tpu.dot_dimension_numbers<[1], [0], [0], [1], [0, 0, 1, 1], [], []>} : vector<20x4xbf16>, vector<4x32xbf16>, vector<20x32xf32> -> vector<20x32xf32>
    %6 = arith.addf %0, %5 : vector<20x32xf32>
    %c0_7 = arith.constant 0 : index
    %c1 = arith.constant 1 : index
    %c0_8 = arith.constant 0 : index
    %c0_9 = arith.constant 0 : index
    %7 = vector.load %arg1[%c0_7, %c1, %c0_8, %c0_9] : memref<1x16x30x4xbf16, #tpu.memory_space<vmem>>, vector<1x1x20x4xbf16>
    %8 = vector.shape_cast %7 : vector<1x1x20x4xbf16> to vector<20x4xbf16>
    %c1_10 = arith.constant 1 : index
    %c0_11 = arith.constant 0 : index
    %c0_12 = arith.constant 0 : index
    %9 = vector.load %arg2[%c1_10, %c0_11, %c0_12] : memref<36x4x32xbf16, #tpu.memory_space<vmem>>, vector<1x4x32xbf16>
    %10 = vector.shape_cast %9 : vector<1x4x32xbf16> to vector<4x32xbf16>
    %cst_13 = arith.constant dense<0.000000e+00> : vector<20x32xf32>
    %11 = tpu.matmul %8, %10, %cst_13 {dimension_numbers = #tpu.dot_dimension_numbers<[1], [0], [0], [1], [0, 0, 1, 1], [], []>} : vector<20x4xbf16>, vector<4x32xbf16>, vector<20x32xf32> -> vector<20x32xf32>
    %12 = arith.addf %6, %11 : vector<20x32xf32>
    %c0_14 = arith.constant 0 : index
    %c2 = arith.constant 2 : index
    %c0_15 = arith.constant 0 : index
    %c0_16 = arith.constant 0 : index
    %13 = vector.load %arg1[%c0_14, %c2, %c0_15, %c0_16] : memref<1x16x30x4xbf16, #tpu.memory_space<vmem>>, vector<1x1x20x4xbf16>
    %14 = vector.shape_cast %13 : vector<1x1x20x4xbf16> to vector<20x4xbf16>
    %c2_17 = arith.constant 2 : index
    %c0_18 = arith.constant 0 : index
    %c0_19 = arith.constant 0 : index
    %15 = vector.load %arg2[%c2_17, %c0_18, %c0_19] : memref<36x4x32xbf16, #tpu.memory_space<vmem>>, vector<1x4x32xbf16>
    %16 = vector.shape_cast %15 : vector<1x4x32xbf16> to vector<4x32xbf16>
    %cst_20 = arith.constant dense<0.000000e+00> : vector<20x32xf32>
    %17 = tpu.matmul %14, %16, %cst_20 {dimension_numbers = #tpu.dot_dimension_numbers<[1], [0], [0], [1], [0, 0, 1, 1], [], []>} : vector<20x4xbf16>, vector<4x32xbf16>, vector<20x32xf32> -> vector<20x32xf32>
    %18 = arith.addf %12, %17 : vector<20x32xf32>
    %c0_21 = arith.constant 0 : index
    %c3 = arith.constant 3 : index
    %c0_22 = arith.constant 0 : index
    %c0_23 = arith.constant 0 : index
    %19 = vector.load %arg1[%c0_21, %c3, %c0_22, %c0_23] : memref<1x16x30x4xbf16, #tpu.memory_space<vmem>>, vector<1x1x20x4xbf16>
    %20 = vector.shape_cast %19 : vector<1x1x20x4xbf16> to vector<20x4xbf16>
    %c3_24 = arith.constant 3 : index
    %c0_25 = arith.constant 0 : index
    %c0_26 = arith.constant 0 : index
    %21 = vector.load %arg2[%c3_24, %c0_25, %c0_26] : memref<36x4x32xbf16, #tpu.memory_space<vmem>>, vector<1x4x32xbf16>
    %22 = vector.shape_cast %21 : vector<1x4x32xbf16> to vector<4x32xbf16>
    %cst_27 = arith.constant dense<0.000000e+00> : vector<20x32xf32>
    %23 = tpu.matmul %20, %22, %cst_27 {dimension_numbers = #tpu.dot_dimension_numbers<[1], [0], [0], [1], [0, 0, 1, 1], [], []>} : vector<20x4xbf16>, vector<4x32xbf16>, vector<20x32xf32> -> vector<20x32xf32>
    %24 = arith.addf %18, %23 : vector<20x32xf32>
    %c0_28 = arith.constant 0 : index
    %c0_29 = arith.constant 0 : index
    %c1_30 = arith.constant 1 : index
    %c0_31 = arith.constant 0 : index
    %25 = vector.load %arg1[%c0_28, %c0_29, %c1_30, %c0_31] : memref<1x16x30x4xbf16, #tpu.memory_space<vmem>>, vector<1x1x20x4xbf16>
    %26 = vector.shape_cast %25 : vector<1x1x20x4xbf16> to vector<20x4xbf16>
    %c4 = arith.constant 4 : index
    %c0_32 = arith.constant 0 : index
    %c0_33 = arith.constant 0 : index
    %27 = vector.load %arg2[%c4, %c0_32, %c0_33] : memref<36x4x32xbf16, #tpu.memory_space<vmem>>, vector<1x4x32xbf16>
    %28 = vector.shape_cast %27 : vector<1x4x32xbf16> to vector<4x32xbf16>
    %cst_34 = arith.constant dense<0.000000e+00> : vector<20x32xf32>
    %29 = tpu.matmul %26, %28, %cst_34 {dimension_numbers = #tpu.dot_dimension_numbers<[1], [0], [0], [1], [0, 0, 1, 1], [], []>} : vector<20x4xbf16>, vector<4x32xbf16>, vector<20x32xf32> -> vector<20x32xf32>
    %30 = arith.addf %24, %29 : vector<20x32xf32>
    %c0_35 = arith.constant 0 : index
    %c1_36 = arith.constant 1 : index
    %c1_37 = arith.constant 1 : index
    %c0_38 = arith.constant 0 : index
    %31 = vector.load %arg1[%c0_35, %c1_36, %c1_37, %c0_38] : memref<1x16x30x4xbf16, #tpu.memory_space<vmem>>, vector<1x1x20x4xbf16>
    %32 = vector.shape_cast %31 : vector<1x1x20x4xbf16> to vector<20x4xbf16>
    %c5 = arith.constant 5 : index
    %c0_39 = arith.constant 0 : index
    %c0_40 = arith.constant 0 : index
    %33 = vector.load %arg2[%c5, %c0_39, %c0_40] : memref<36x4x32xbf16, #tpu.memory_space<vmem>>, vector<1x4x32xbf16>
    %34 = vector.shape_cast %33 : vector<1x4x32xbf16> to vector<4x32xbf16>
    %cst_41 = arith.constant dense<0.000000e+00> : vector<20x32xf32>
    %35 = tpu.matmul %32, %34, %cst_41 {dimension_numbers = #tpu.dot_dimension_numbers<[1], [0], [0], [1], [0, 0, 1, 1], [], []>} : vector<20x4xbf16>, vector<4x32xbf16>, vector<20x32xf32> -> vector<20x32xf32>
    %36 = arith.addf %30, %35 : vector<20x32xf32>
    %c0_42 = arith.constant 0 : index
    %c4_43 = arith.constant 4 : index
    %c0_44 = arith.constant 0 : index
    %c0_45 = arith.constant 0 : index
    %37 = vector.load %arg1[%c0_42, %c4_43, %c0_44, %c0_45] : memref<1x16x30x4xbf16, #tpu.memory_space<vmem>>, vector<1x1x20x4xbf16>
    %38 = vector.shape_cast %37 : vector<1x1x20x4xbf16> to vector<20x4xbf16>
    %c6 = arith.constant 6 : index
    %c0_46 = arith.constant 0 : index
    %c0_47 = arith.constant 0 : index
    %39 = vector.load %arg2[%c6, %c0_46, %c0_47] : memref<36x4x32xbf16, #tpu.memory_space<vmem>>, vector<1x4x32xbf16>
    %40 = vector.shape_cast %39 : vector<1x4x32xbf16> to vector<4x32xbf16>
    %cst_48 = arith.constant dense<0.000000e+00> : vector<20x32xf32>
    %41 = tpu.matmul %38, %40, %cst_48 {dimension_numbers = #tpu.dot_dimension_numbers<[1], [0], [0], [1], [0, 0, 1, 1], [], []>} : vector<20x4xbf16>, vector<4x32xbf16>, vector<20x32xf32> -> vector<20x32xf32>
    %42 = arith.addf %36, %41 : vector<20x32xf32>
    %c0_49 = arith.constant 0 : index
    %c5_50 = arith.constant 5 : index
    %c0_51 = arith.constant 0 : index
    %c0_52 = arith.constant 0 : index
    %43 = vector.load %arg1[%c0_49, %c5_50, %c0_51, %c0_52] : memref<1x16x30x4xbf16, #tpu.memory_space<vmem>>, vector<1x1x20x4xbf16>
    %44 = vector.shape_cast %43 : vector<1x1x20x4xbf16> to vector<20x4xbf16>
    %c7 = arith.constant 7 : index
    %c0_53 = arith.constant 0 : index
    %c0_54 = arith.constant 0 : index
    %45 = vector.load %arg2[%c7, %c0_53, %c0_54] : memref<36x4x32xbf16, #tpu.memory_space<vmem>>, vector<1x4x32xbf16>
    %46 = vector.shape_cast %45 : vector<1x4x32xbf16> to vector<4x32xbf16>
    %cst_55 = arith.constant dense<0.000000e+00> : vector<20x32xf32>
    %47 = tpu.matmul %44, %46, %cst_55 {dimension_numbers = #tpu.dot_dimension_numbers<[1], [0], [0], [1], [0, 0, 1, 1], [], []>} : vector<20x4xbf16>, vector<4x32xbf16>, vector<20x32xf32> -> vector<20x32xf32>
    %48 = arith.addf %42, %47 : vector<20x32xf32>
    %c0_56 = arith.constant 0 : index
    %c6_57 = arith.constant 6 : index
    %c0_58 = arith.constant 0 : index
    %c0_59 = arith.constant 0 : index
    %49 = vector.load %arg1[%c0_56, %c6_57, %c0_58, %c0_59] : memref<1x16x30x4xbf16, #tpu.memory_space<vmem>>, vector<1x1x20x4xbf16>
    %50 = vector.shape_cast %49 : vector<1x1x20x4xbf16> to vector<20x4xbf16>
    %c8 = arith.constant 8 : index
    %c0_60 = arith.constant 0 : index
    %c0_61 = arith.constant 0 : index
    %51 = vector.load %arg2[%c8, %c0_60, %c0_61] : memref<36x4x32xbf16, #tpu.memory_space<vmem>>, vector<1x4x32xbf16>
    %52 = vector.shape_cast %51 : vector<1x4x32xbf16> to vector<4x32xbf16>
    %cst_62 = arith.constant dense<0.000000e+00> : vector<20x32xf32>
    %53 = tpu.matmul %50, %52, %cst_62 {dimension_numbers = #tpu.dot_dimension_numbers<[1], [0], [0], [1], [0, 0, 1, 1], [], []>} : vector<20x4xbf16>, vector<4x32xbf16>, vector<20x32xf32> -> vector<20x32xf32>
    %54 = arith.addf %48, %53 : vector<20x32xf32>
    %c0_63 = arith.constant 0 : index
    %c7_64 = arith.constant 7 : index
    %c0_65 = arith.constant 0 : index
    %c0_66 = arith.constant 0 : index
    %55 = vector.load %arg1[%c0_63, %c7_64, %c0_65, %c0_66] : memref<1x16x30x4xbf16, #tpu.memory_space<vmem>>, vector<1x1x20x4xbf16>
    %56 = vector.shape_cast %55 : vector<1x1x20x4xbf16> to vector<20x4xbf16>
    %c9 = arith.constant 9 : index
    %c0_67 = arith.constant 0 : index
    %c0_68 = arith.constant 0 : index
    %57 = vector.load %arg2[%c9, %c0_67, %c0_68] : memref<36x4x32xbf16, #tpu.memory_space<vmem>>, vector<1x4x32xbf16>
    %58 = vector.shape_cast %57 : vector<1x4x32xbf16> to vector<4x32xbf16>
    %cst_69 = arith.constant dense<0.000000e+00> : vector<20x32xf32>
    %59 = tpu.matmul %56, %58, %cst_69 {dimension_numbers = #tpu.dot_dimension_numbers<[1], [0], [0], [1], [0, 0, 1, 1], [], []>} : vector<20x4xbf16>, vector<4x32xbf16>, vector<20x32xf32> -> vector<20x32xf32>
    %60 = arith.addf %54, %59 : vector<20x32xf32>
    %c0_70 = arith.constant 0 : index
    %c4_71 = arith.constant 4 : index
    %c1_72 = arith.constant 1 : index
    %c0_73 = arith.constant 0 : index
    %61 = vector.load %arg1[%c0_70, %c4_71, %c1_72, %c0_73] : memref<1x16x30x4xbf16, #tpu.memory_space<vmem>>, vector<1x1x20x4xbf16>
    %62 = vector.shape_cast %61 : vector<1x1x20x4xbf16> to vector<20x4xbf16>
    %c10 = arith.constant 10 : index
    %c0_74 = arith.constant 0 : index
    %c0_75 = arith.constant 0 : index
    %63 = vector.load %arg2[%c10, %c0_74, %c0_75] : memref<36x4x32xbf16, #tpu.memory_space<vmem>>, vector<1x4x32xbf16>
    %64 = vector.shape_cast %63 : vector<1x4x32xbf16> to vector<4x32xbf16>
    %cst_76 = arith.constant dense<0.000000e+00> : vector<20x32xf32>
    %65 = tpu.matmul %62, %64, %cst_76 {dimension_numbers = #tpu.dot_dimension_numbers<[1], [0], [0], [1], [0, 0, 1, 1], [], []>} : vector<20x4xbf16>, vector<4x32xbf16>, vector<20x32xf32> -> vector<20x32xf32>
    %66 = arith.addf %60, %65 : vector<20x32xf32>
    %c0_77 = arith.constant 0 : index
    %c5_78 = arith.constant 5 : index
    %c1_79 = arith.constant 1 : index
    %c0_80 = arith.constant 0 : index
    %67 = vector.load %arg1[%c0_77, %c5_78, %c1_79, %c0_80] : memref<1x16x30x4xbf16, #tpu.memory_space<vmem>>, vector<1x1x20x4xbf16>
    %68 = vector.shape_cast %67 : vector<1x1x20x4xbf16> to vector<20x4xbf16>
    %c11 = arith.constant 11 : index
    %c0_81 = arith.constant 0 : index
    %c0_82 = arith.constant 0 : index
    %69 = vector.load %arg2[%c11, %c0_81, %c0_82] : memref<36x4x32xbf16, #tpu.memory_space<vmem>>, vector<1x4x32xbf16>
    %70 = vector.shape_cast %69 : vector<1x4x32xbf16> to vector<4x32xbf16>
    %cst_83 = arith.constant dense<0.000000e+00> : vector<20x32xf32>
    %71 = tpu.matmul %68, %70, %cst_83 {dimension_numbers = #tpu.dot_dimension_numbers<[1], [0], [0], [1], [0, 0, 1, 1], [], []>} : vector<20x4xbf16>, vector<4x32xbf16>, vector<20x32xf32> -> vector<20x32xf32>
    %72 = arith.addf %66, %71 : vector<20x32xf32>
    %c0_84 = arith.constant 0 : index
    %c8_85 = arith.constant 8 : index
    %c0_86 = arith.constant 0 : index
    %c0_87 = arith.constant 0 : index
    %73 = vector.load %arg1[%c0_84, %c8_85, %c0_86, %c0_87] : memref<1x16x30x4xbf16, #tpu.memory_space<vmem>>, vector<1x1x20x4xbf16>
    %74 = vector.shape_cast %73 : vector<1x1x20x4xbf16> to vector<20x4xbf16>
    %c12 = arith.constant 12 : index
    %c0_88 = arith.constant 0 : index
    %c0_89 = arith.constant 0 : index
    %75 = vector.load %arg2[%c12, %c0_88, %c0_89] : memref<36x4x32xbf16, #tpu.memory_space<vmem>>, vector<1x4x32xbf16>
    %76 = vector.shape_cast %75 : vector<1x4x32xbf16> to vector<4x32xbf16>
    %cst_90 = arith.constant dense<0.000000e+00> : vector<20x32xf32>
    %77 = tpu.matmul %74, %76, %cst_90 {dimension_numbers = #tpu.dot_dimension_numbers<[1], [0], [0], [1], [0, 0, 1, 1], [], []>} : vector<20x4xbf16>, vector<4x32xbf16>, vector<20x32xf32> -> vector<20x32xf32>
    %78 = arith.addf %72, %77 : vector<20x32xf32>
    %c0_91 = arith.constant 0 : index
    %c9_92 = arith.constant 9 : index
    %c0_93 = arith.constant 0 : index
    %c0_94 = arith.constant 0 : index
    %79 = vector.load %arg1[%c0_91, %c9_92, %c0_93, %c0_94] : memref<1x16x30x4xbf16, #tpu.memory_space<vmem>>, vector<1x1x20x4xbf16>
    %80 = vector.shape_cast %79 : vector<1x1x20x4xbf16> to vector<20x4xbf16>
    %c13 = arith.constant 13 : index
    %c0_95 = arith.constant 0 : index
    %c0_96 = arith.constant 0 : index
    %81 = vector.load %arg2[%c13, %c0_95, %c0_96] : memref<36x4x32xbf16, #tpu.memory_space<vmem>>, vector<1x4x32xbf16>
    %82 = vector.shape_cast %81 : vector<1x4x32xbf16> to vector<4x32xbf16>
    %cst_97 = arith.constant dense<0.000000e+00> : vector<20x32xf32>
    %83 = tpu.matmul %80, %82, %cst_97 {dimension_numbers = #tpu.dot_dimension_numbers<[1], [0], [0], [1], [0, 0, 1, 1], [], []>} : vector<20x4xbf16>, vector<4x32xbf16>, vector<20x32xf32> -> vector<20x32xf32>
    %84 = arith.addf %78, %83 : vector<20x32xf32>
    %c0_98 = arith.constant 0 : index
    %c10_99 = arith.constant 10 : index
    %c0_100 = arith.constant 0 : index
    %c0_101 = arith.constant 0 : index
    %85 = vector.load %arg1[%c0_98, %c10_99, %c0_100, %c0_101] : memref<1x16x30x4xbf16, #tpu.memory_space<vmem>>, vector<1x1x20x4xbf16>
    %86 = vector.shape_cast %85 : vector<1x1x20x4xbf16> to vector<20x4xbf16>
    %c14 = arith.constant 14 : index
    %c0_102 = arith.constant 0 : index
    %c0_103 = arith.constant 0 : index
    %87 = vector.load %arg2[%c14, %c0_102, %c0_103] : memref<36x4x32xbf16, #tpu.memory_space<vmem>>, vector<1x4x32xbf16>
    %88 = vector.shape_cast %87 : vector<1x4x32xbf16> to vector<4x32xbf16>
    %cst_104 = arith.constant dense<0.000000e+00> : vector<20x32xf32>
    %89 = tpu.matmul %86, %88, %cst_104 {dimension_numbers = #tpu.dot_dimension_numbers<[1], [0], [0], [1], [0, 0, 1, 1], [], []>} : vector<20x4xbf16>, vector<4x32xbf16>, vector<20x32xf32> -> vector<20x32xf32>
    %90 = arith.addf %84, %89 : vector<20x32xf32>
    %c0_105 = arith.constant 0 : index
    %c11_106 = arith.constant 11 : index
    %c0_107 = arith.constant 0 : index
    %c0_108 = arith.constant 0 : index
    %91 = vector.load %arg1[%c0_105, %c11_106, %c0_107, %c0_108] : memref<1x16x30x4xbf16, #tpu.memory_space<vmem>>, vector<1x1x20x4xbf16>
    %92 = vector.shape_cast %91 : vector<1x1x20x4xbf16> to vector<20x4xbf16>
    %c15 = arith.constant 15 : index
    %c0_109 = arith.constant 0 : index
    %c0_110 = arith.constant 0 : index
    %93 = vector.load %arg2[%c15, %c0_109, %c0_110] : memref<36x4x32xbf16, #tpu.memory_space<vmem>>, vector<1x4x32xbf16>
    %94 = vector.shape_cast %93 : vector<1x4x32xbf16> to vector<4x32xbf16>
    %cst_111 = arith.constant dense<0.000000e+00> : vector<20x32xf32>
    %95 = tpu.matmul %92, %94, %cst_111 {dimension_numbers = #tpu.dot_dimension_numbers<[1], [0], [0], [1], [0, 0, 1, 1], [], []>} : vector<20x4xbf16>, vector<4x32xbf16>, vector<20x32xf32> -> vector<20x32xf32>
    %96 = arith.addf %90, %95 : vector<20x32xf32>
    %c0_112 = arith.constant 0 : index
    %c8_113 = arith.constant 8 : index
    %c1_114 = arith.constant 1 : index
    %c0_115 = arith.constant 0 : index
    %97 = vector.load %arg1[%c0_112, %c8_113, %c1_114, %c0_115] : memref<1x16x30x4xbf16, #tpu.memory_space<vmem>>, vector<1x1x20x4xbf16>
    %98 = vector.shape_cast %97 : vector<1x1x20x4xbf16> to vector<20x4xbf16>
    %c16 = arith.constant 16 : index
    %c0_116 = arith.constant 0 : index
    %c0_117 = arith.constant 0 : index
    %99 = vector.load %arg2[%c16, %c0_116, %c0_117] : memref<36x4x32xbf16, #tpu.memory_space<vmem>>, vector<1x4x32xbf16>
    %100 = vector.shape_cast %99 : vector<1x4x32xbf16> to vector<4x32xbf16>
    %cst_118 = arith.constant dense<0.000000e+00> : vector<20x32xf32>
    %101 = tpu.matmul %98, %100, %cst_118 {dimension_numbers = #tpu.dot_dimension_numbers<[1], [0], [0], [1], [0, 0, 1, 1], [], []>} : vector<20x4xbf16>, vector<4x32xbf16>, vector<20x32xf32> -> vector<20x32xf32>
    %102 = arith.addf %96, %101 : vector<20x32xf32>
    %c0_119 = arith.constant 0 : index
    %c9_120 = arith.constant 9 : index
    %c1_121 = arith.constant 1 : index
    %c0_122 = arith.constant 0 : index
    %103 = vector.load %arg1[%c0_119, %c9_120, %c1_121, %c0_122] : memref<1x16x30x4xbf16, #tpu.memory_space<vmem>>, vector<1x1x20x4xbf16>
    %104 = vector.shape_cast %103 : vector<1x1x20x4xbf16> to vector<20x4xbf16>
    %c17 = arith.constant 17 : index
    %c0_123 = arith.constant 0 : index
    %c0_124 = arith.constant 0 : index
    %105 = vector.load %arg2[%c17, %c0_123, %c0_124] : memref<36x4x32xbf16, #tpu.memory_space<vmem>>, vector<1x4x32xbf16>
    %106 = vector.shape_cast %105 : vector<1x4x32xbf16> to vector<4x32xbf16>
    %cst_125 = arith.constant dense<0.000000e+00> : vector<20x32xf32>
    %107 = tpu.matmul %104, %106, %cst_125 {dimension_numbers = #tpu.dot_dimension_numbers<[1], [0], [0], [1], [0, 0, 1, 1], [], []>} : vector<20x4xbf16>, vector<4x32xbf16>, vector<20x32xf32> -> vector<20x32xf32>
    %108 = arith.addf %102, %107 : vector<20x32xf32>
    %c0_126 = arith.constant 0 : index
    %c12_127 = arith.constant 12 : index
    %c0_128 = arith.constant 0 : index
    %c0_129 = arith.constant 0 : index
    %109 = vector.load %arg1[%c0_126, %c12_127, %c0_128, %c0_129] : memref<1x16x30x4xbf16, #tpu.memory_space<vmem>>, vector<1x1x20x4xbf16>
    %110 = vector.shape_cast %109 : vector<1x1x20x4xbf16> to vector<20x4xbf16>
    %c18 = arith.constant 18 : index
    %c0_130 = arith.constant 0 : index
    %c0_131 = arith.constant 0 : index
    %111 = vector.load %arg2[%c18, %c0_130, %c0_131] : memref<36x4x32xbf16, #tpu.memory_space<vmem>>, vector<1x4x32xbf16>
    %112 = vector.shape_cast %111 : vector<1x4x32xbf16> to vector<4x32xbf16>
    %cst_132 = arith.constant dense<0.000000e+00> : vector<20x32xf32>
    %113 = tpu.matmul %110, %112, %cst_132 {dimension_numbers = #tpu.dot_dimension_numbers<[1], [0], [0], [1], [0, 0, 1, 1], [], []>} : vector<20x4xbf16>, vector<4x32xbf16>, vector<20x32xf32> -> vector<20x32xf32>
    %114 = arith.addf %108, %113 : vector<20x32xf32>
    %c0_133 = arith.constant 0 : index
    %c13_134 = arith.constant 13 : index
    %c0_135 = arith.constant 0 : index
    %c0_136 = arith.constant 0 : index
    %115 = vector.load %arg1[%c0_133, %c13_134, %c0_135, %c0_136] : memref<1x16x30x4xbf16, #tpu.memory_space<vmem>>, vector<1x1x20x4xbf16>
    %116 = vector.shape_cast %115 : vector<1x1x20x4xbf16> to vector<20x4xbf16>
    %c19 = arith.constant 19 : index
    %c0_137 = arith.constant 0 : index
    %c0_138 = arith.constant 0 : index
    %117 = vector.load %arg2[%c19, %c0_137, %c0_138] : memref<36x4x32xbf16, #tpu.memory_space<vmem>>, vector<1x4x32xbf16>
    %118 = vector.shape_cast %117 : vector<1x4x32xbf16> to vector<4x32xbf16>
    %cst_139 = arith.constant dense<0.000000e+00> : vector<20x32xf32>
    %119 = tpu.matmul %116, %118, %cst_139 {dimension_numbers = #tpu.dot_dimension_numbers<[1], [0], [0], [1], [0, 0, 1, 1], [], []>} : vector<20x4xbf16>, vector<4x32xbf16>, vector<20x32xf32> -> vector<20x32xf32>
    %120 = arith.addf %114, %119 : vector<20x32xf32>
    %c0_140 = arith.constant 0 : index
    %c14_141 = arith.constant 14 : index
    %c0_142 = arith.constant 0 : index
    %c0_143 = arith.constant 0 : index
    %121 = vector.load %arg1[%c0_140, %c14_141, %c0_142, %c0_143] : memref<1x16x30x4xbf16, #tpu.memory_space<vmem>>, vector<1x1x20x4xbf16>
    %122 = vector.shape_cast %121 : vector<1x1x20x4xbf16> to vector<20x4xbf16>
    %c20 = arith.constant 20 : index
    %c0_144 = arith.constant 0 : index
    %c0_145 = arith.constant 0 : index
    %123 = vector.load %arg2[%c20, %c0_144, %c0_145] : memref<36x4x32xbf16, #tpu.memory_space<vmem>>, vector<1x4x32xbf16>
    %124 = vector.shape_cast %123 : vector<1x4x32xbf16> to vector<4x32xbf16>
    %cst_146 = arith.constant dense<0.000000e+00> : vector<20x32xf32>
    %125 = tpu.matmul %122, %124, %cst_146 {dimension_numbers = #tpu.dot_dimension_numbers<[1], [0], [0], [1], [0, 0, 1, 1], [], []>} : vector<20x4xbf16>, vector<4x32xbf16>, vector<20x32xf32> -> vector<20x32xf32>
    %126 = arith.addf %120, %125 : vector<20x32xf32>
    %c0_147 = arith.constant 0 : index
    %c15_148 = arith.constant 15 : index
    %c0_149 = arith.constant 0 : index
    %c0_150 = arith.constant 0 : index
    %127 = vector.load %arg1[%c0_147, %c15_148, %c0_149, %c0_150] : memref<1x16x30x4xbf16, #tpu.memory_space<vmem>>, vector<1x1x20x4xbf16>
    %128 = vector.shape_cast %127 : vector<1x1x20x4xbf16> to vector<20x4xbf16>
    %c21 = arith.constant 21 : index
    %c0_151 = arith.constant 0 : index
    %c0_152 = arith.constant 0 : index
    %129 = vector.load %arg2[%c21, %c0_151, %c0_152] : memref<36x4x32xbf16, #tpu.memory_space<vmem>>, vector<1x4x32xbf16>
    %130 = vector.shape_cast %129 : vector<1x4x32xbf16> to vector<4x32xbf16>
    %cst_153 = arith.constant dense<0.000000e+00> : vector<20x32xf32>
    %131 = tpu.matmul %128, %130, %cst_153 {dimension_numbers = #tpu.dot_dimension_numbers<[1], [0], [0], [1], [0, 0, 1, 1], [], []>} : vector<20x4xbf16>, vector<4x32xbf16>, vector<20x32xf32> -> vector<20x32xf32>
    %132 = arith.addf %126, %131 : vector<20x32xf32>
    %c0_154 = arith.constant 0 : index
    %c12_155 = arith.constant 12 : index
    %c1_156 = arith.constant 1 : index
    %c0_157 = arith.constant 0 : index
    %133 = vector.load %arg1[%c0_154, %c12_155, %c1_156, %c0_157] : memref<1x16x30x4xbf16, #tpu.memory_space<vmem>>, vector<1x1x20x4xbf16>
    %134 = vector.shape_cast %133 : vector<1x1x20x4xbf16> to vector<20x4xbf16>
    %c22 = arith.constant 22 : index
    %c0_158 = arith.constant 0 : index
    %c0_159 = arith.constant 0 : index
    %135 = vector.load %arg2[%c22, %c0_158, %c0_159] : memref<36x4x32xbf16, #tpu.memory_space<vmem>>, vector<1x4x32xbf16>
    %136 = vector.shape_cast %135 : vector<1x4x32xbf16> to vector<4x32xbf16>
    %cst_160 = arith.constant dense<0.000000e+00> : vector<20x32xf32>
    %137 = tpu.matmul %134, %136, %cst_160 {dimension_numbers = #tpu.dot_dimension_numbers<[1], [0], [0], [1], [0, 0, 1, 1], [], []>} : vector<20x4xbf16>, vector<4x32xbf16>, vector<20x32xf32> -> vector<20x32xf32>
    %138 = arith.addf %132, %137 : vector<20x32xf32>
    %c0_161 = arith.constant 0 : index
    %c13_162 = arith.constant 13 : index
    %c1_163 = arith.constant 1 : index
    %c0_164 = arith.constant 0 : index
    %139 = vector.load %arg1[%c0_161, %c13_162, %c1_163, %c0_164] : memref<1x16x30x4xbf16, #tpu.memory_space<vmem>>, vector<1x1x20x4xbf16>
    %140 = vector.shape_cast %139 : vector<1x1x20x4xbf16> to vector<20x4xbf16>
    %c23 = arith.constant 23 : index
    %c0_165 = arith.constant 0 : index
    %c0_166 = arith.constant 0 : index
    %141 = vector.load %arg2[%c23, %c0_165, %c0_166] : memref<36x4x32xbf16, #tpu.memory_space<vmem>>, vector<1x4x32xbf16>
    %142 = vector.shape_cast %141 : vector<1x4x32xbf16> to vector<4x32xbf16>
    %cst_167 = arith.constant dense<0.000000e+00> : vector<20x32xf32>
    %143 = tpu.matmul %140, %142, %cst_167 {dimension_numbers = #tpu.dot_dimension_numbers<[1], [0], [0], [1], [0, 0, 1, 1], [], []>} : vector<20x4xbf16>, vector<4x32xbf16>, vector<20x32xf32> -> vector<20x32xf32>
    %144 = arith.addf %138, %143 : vector<20x32xf32>
    %c0_168 = arith.constant 0 : index
    %c0_169 = arith.constant 0 : index
    %c5_170 = arith.constant 5 : index
    %c0_171 = arith.constant 0 : index
    %145 = vector.load %arg1[%c0_168, %c0_169, %c5_170, %c0_171] : memref<1x16x30x4xbf16, #tpu.memory_space<vmem>>, vector<1x1x20x4xbf16>
    %146 = vector.shape_cast %145 : vector<1x1x20x4xbf16> to vector<20x4xbf16>
    %c24 = arith.constant 24 : index
    %c0_172 = arith.constant 0 : index
    %c0_173 = arith.constant 0 : index
    %147 = vector.load %arg2[%c24, %c0_172, %c0_173] : memref<36x4x32xbf16, #tpu.memory_space<vmem>>, vector<1x4x32xbf16>
    %148 = vector.shape_cast %147 : vector<1x4x32xbf16> to vector<4x32xbf16>
    %cst_174 = arith.constant dense<0.000000e+00> : vector<20x32xf32>
    %149 = tpu.matmul %146, %148, %cst_174 {dimension_numbers = #tpu.dot_dimension_numbers<[1], [0], [0], [1], [0, 0, 1, 1], [], []>} : vector<20x4xbf16>, vector<4x32xbf16>, vector<20x32xf32> -> vector<20x32xf32>
    %150 = arith.addf %144, %149 : vector<20x32xf32>
    %c0_175 = arith.constant 0 : index
    %c1_176 = arith.constant 1 : index
    %c5_177 = arith.constant 5 : index
    %c0_178 = arith.constant 0 : index
    %151 = vector.load %arg1[%c0_175, %c1_176, %c5_177, %c0_178] : memref<1x16x30x4xbf16, #tpu.memory_space<vmem>>, vector<1x1x20x4xbf16>
    %152 = vector.shape_cast %151 : vector<1x1x20x4xbf16> to vector<20x4xbf16>
    %c25 = arith.constant 25 : index
    %c0_179 = arith.constant 0 : index
    %c0_180 = arith.constant 0 : index
    %153 = vector.load %arg2[%c25, %c0_179, %c0_180] : memref<36x4x32xbf16, #tpu.memory_space<vmem>>, vector<1x4x32xbf16>
    %154 = vector.shape_cast %153 : vector<1x4x32xbf16> to vector<4x32xbf16>
    %cst_181 = arith.constant dense<0.000000e+00> : vector<20x32xf32>
    %155 = tpu.matmul %152, %154, %cst_181 {dimension_numbers = #tpu.dot_dimension_numbers<[1], [0], [0], [1], [0, 0, 1, 1], [], []>} : vector<20x4xbf16>, vector<4x32xbf16>, vector<20x32xf32> -> vector<20x32xf32>
    %156 = arith.addf %150, %155 : vector<20x32xf32>
    %c0_182 = arith.constant 0 : index
    %c2_183 = arith.constant 2 : index
    %c5_184 = arith.constant 5 : index
    %c0_185 = arith.constant 0 : index
    %157 = vector.load %arg1[%c0_182, %c2_183, %c5_184, %c0_185] : memref<1x16x30x4xbf16, #tpu.memory_space<vmem>>, vector<1x1x20x4xbf16>
    %158 = vector.shape_cast %157 : vector<1x1x20x4xbf16> to vector<20x4xbf16>
    %c26 = arith.constant 26 : index
    %c0_186 = arith.constant 0 : index
    %c0_187 = arith.constant 0 : index
    %159 = vector.load %arg2[%c26, %c0_186, %c0_187] : memref<36x4x32xbf16, #tpu.memory_space<vmem>>, vector<1x4x32xbf16>
    %160 = vector.shape_cast %159 : vector<1x4x32xbf16> to vector<4x32xbf16>
    %cst_188 = arith.constant dense<0.000000e+00> : vector<20x32xf32>
    %161 = tpu.matmul %158, %160, %cst_188 {dimension_numbers = #tpu.dot_dimension_numbers<[1], [0], [0], [1], [0, 0, 1, 1], [], []>} : vector<20x4xbf16>, vector<4x32xbf16>, vector<20x32xf32> -> vector<20x32xf32>
    %162 = arith.addf %156, %161 : vector<20x32xf32>
    %c0_189 = arith.constant 0 : index
    %c3_190 = arith.constant 3 : index
    %c5_191 = arith.constant 5 : index
    %c0_192 = arith.constant 0 : index
    %163 = vector.load %arg1[%c0_189, %c3_190, %c5_191, %c0_192] : memref<1x16x30x4xbf16, #tpu.memory_space<vmem>>, vector<1x1x20x4xbf16>
    %164 = vector.shape_cast %163 : vector<1x1x20x4xbf16> to vector<20x4xbf16>
    %c27 = arith.constant 27 : index
    %c0_193 = arith.constant 0 : index
    %c0_194 = arith.constant 0 : index
    %165 = vector.load %arg2[%c27, %c0_193, %c0_194] : memref<36x4x32xbf16, #tpu.memory_space<vmem>>, vector<1x4x32xbf16>
    %166 = vector.shape_cast %165 : vector<1x4x32xbf16> to vector<4x32xbf16>
    %cst_195 = arith.constant dense<0.000000e+00> : vector<20x32xf32>
    %167 = tpu.matmul %164, %166, %cst_195 {dimension_numbers = #tpu.dot_dimension_numbers<[1], [0], [0], [1], [0, 0, 1, 1], [], []>} : vector<20x4xbf16>, vector<4x32xbf16>, vector<20x32xf32> -> vector<20x32xf32>
    %168 = arith.addf %162, %167 : vector<20x32xf32>
    %c0_196 = arith.constant 0 : index
    %c0_197 = arith.constant 0 : index
    %c6_198 = arith.constant 6 : index
    %c0_199 = arith.constant 0 : index
    %169 = vector.load %arg1[%c0_196, %c0_197, %c6_198, %c0_199] : memref<1x16x30x4xbf16, #tpu.memory_space<vmem>>, vector<1x1x20x4xbf16>
    %170 = vector.shape_cast %169 : vector<1x1x20x4xbf16> to vector<20x4xbf16>
    %c28 = arith.constant 28 : index
    %c0_200 = arith.constant 0 : index
    %c0_201 = arith.constant 0 : index
    %171 = vector.load %arg2[%c28, %c0_200, %c0_201] : memref<36x4x32xbf16, #tpu.memory_space<vmem>>, vector<1x4x32xbf16>
    %172 = vector.shape_cast %171 : vector<1x4x32xbf16> to vector<4x32xbf16>
    %cst_202 = arith.constant dense<0.000000e+00> : vector<20x32xf32>
    %173 = tpu.matmul %170, %172, %cst_202 {dimension_numbers = #tpu.dot_dimension_numbers<[1], [0], [0], [1], [0, 0, 1, 1], [], []>} : vector<20x4xbf16>, vector<4x32xbf16>, vector<20x32xf32> -> vector<20x32xf32>
    %174 = arith.addf %168, %173 : vector<20x32xf32>
    %c0_203 = arith.constant 0 : index
    %c1_204 = arith.constant 1 : index
    %c6_205 = arith.constant 6 : index
    %c0_206 = arith.constant 0 : index
    %175 = vector.load %arg1[%c0_203, %c1_204, %c6_205, %c0_206] : memref<1x16x30x4xbf16, #tpu.memory_space<vmem>>, vector<1x1x20x4xbf16>
    %176 = vector.shape_cast %175 : vector<1x1x20x4xbf16> to vector<20x4xbf16>
    %c29 = arith.constant 29 : index
    %c0_207 = arith.constant 0 : index
    %c0_208 = arith.constant 0 : index
    %177 = vector.load %arg2[%c29, %c0_207, %c0_208] : memref<36x4x32xbf16, #tpu.memory_space<vmem>>, vector<1x4x32xbf16>
    %178 = vector.shape_cast %177 : vector<1x4x32xbf16> to vector<4x32xbf16>
    %cst_209 = arith.constant dense<0.000000e+00> : vector<20x32xf32>
    %179 = tpu.matmul %176, %178, %cst_209 {dimension_numbers = #tpu.dot_dimension_numbers<[1], [0], [0], [1], [0, 0, 1, 1], [], []>} : vector<20x4xbf16>, vector<4x32xbf16>, vector<20x32xf32> -> vector<20x32xf32>
    %180 = arith.addf %174, %179 : vector<20x32xf32>
    %c0_210 = arith.constant 0 : index
    %c4_211 = arith.constant 4 : index
    %c5_212 = arith.constant 5 : index
    %c0_213 = arith.constant 0 : index
    %181 = vector.load %arg1[%c0_210, %c4_211, %c5_212, %c0_213] : memref<1x16x30x4xbf16, #tpu.memory_space<vmem>>, vector<1x1x20x4xbf16>
    %182 = vector.shape_cast %181 : vector<1x1x20x4xbf16> to vector<20x4xbf16>
    %c30 = arith.constant 30 : index
    %c0_214 = arith.constant 0 : index
    %c0_215 = arith.constant 0 : index
    %183 = vector.load %arg2[%c30, %c0_214, %c0_215] : memref<36x4x32xbf16, #tpu.memory_space<vmem>>, vector<1x4x32xbf16>
    %184 = vector.shape_cast %183 : vector<1x4x32xbf16> to vector<4x32xbf16>
    %cst_216 = arith.constant dense<0.000000e+00> : vector<20x32xf32>
    %185 = tpu.matmul %182, %184, %cst_216 {dimension_numbers = #tpu.dot_dimension_numbers<[1], [0], [0], [1], [0, 0, 1, 1], [], []>} : vector<20x4xbf16>, vector<4x32xbf16>, vector<20x32xf32> -> vector<20x32xf32>
    %186 = arith.addf %180, %185 : vector<20x32xf32>
    %c0_217 = arith.constant 0 : index
    %c5_218 = arith.constant 5 : index
    %c5_219 = arith.constant 5 : index
    %c0_220 = arith.constant 0 : index
    %187 = vector.load %arg1[%c0_217, %c5_218, %c5_219, %c0_220] : memref<1x16x30x4xbf16, #tpu.memory_space<vmem>>, vector<1x1x20x4xbf16>
    %188 = vector.shape_cast %187 : vector<1x1x20x4xbf16> to vector<20x4xbf16>
    %c31 = arith.constant 31 : index
    %c0_221 = arith.constant 0 : index
    %c0_222 = arith.constant 0 : index
    %189 = vector.load %arg2[%c31, %c0_221, %c0_222] : memref<36x4x32xbf16, #tpu.memory_space<vmem>>, vector<1x4x32xbf16>
    %190 = vector.shape_cast %189 : vector<1x4x32xbf16> to vector<4x32xbf16>
    %cst_223 = arith.constant dense<0.000000e+00> : vector<20x32xf32>
    %191 = tpu.matmul %188, %190, %cst_223 {dimension_numbers = #tpu.dot_dimension_numbers<[1], [0], [0], [1], [0, 0, 1, 1], [], []>} : vector<20x4xbf16>, vector<4x32xbf16>, vector<20x32xf32> -> vector<20x32xf32>
    %192 = arith.addf %186, %191 : vector<20x32xf32>
    %c0_224 = arith.constant 0 : index
    %c6_225 = arith.constant 6 : index
    %c5_226 = arith.constant 5 : index
    %c0_227 = arith.constant 0 : index
    %193 = vector.load %arg1[%c0_224, %c6_225, %c5_226, %c0_227] : memref<1x16x30x4xbf16, #tpu.memory_space<vmem>>, vector<1x1x20x4xbf16>
    %194 = vector.shape_cast %193 : vector<1x1x20x4xbf16> to vector<20x4xbf16>
    %c32 = arith.constant 32 : index
    %c0_228 = arith.constant 0 : index
    %c0_229 = arith.constant 0 : index
    %195 = vector.load %arg2[%c32, %c0_228, %c0_229] : memref<36x4x32xbf16, #tpu.memory_space<vmem>>, vector<1x4x32xbf16>
    %196 = vector.shape_cast %195 : vector<1x4x32xbf16> to vector<4x32xbf16>
    %cst_230 = arith.constant dense<0.000000e+00> : vector<20x32xf32>
    %197 = tpu.matmul %194, %196, %cst_230 {dimension_numbers = #tpu.dot_dimension_numbers<[1], [0], [0], [1], [0, 0, 1, 1], [], []>} : vector<20x4xbf16>, vector<4x32xbf16>, vector<20x32xf32> -> vector<20x32xf32>
    %198 = arith.addf %192, %197 : vector<20x32xf32>
    %c0_231 = arith.constant 0 : index
    %c7_232 = arith.constant 7 : index
    %c5_233 = arith.constant 5 : index
    %c0_234 = arith.constant 0 : index
    %199 = vector.load %arg1[%c0_231, %c7_232, %c5_233, %c0_234] : memref<1x16x30x4xbf16, #tpu.memory_space<vmem>>, vector<1x1x20x4xbf16>
    %200 = vector.shape_cast %199 : vector<1x1x20x4xbf16> to vector<20x4xbf16>
    %c33 = arith.constant 33 : index
    %c0_235 = arith.constant 0 : index
    %c0_236 = arith.constant 0 : index
    %201 = vector.load %arg2[%c33, %c0_235, %c0_236] : memref<36x4x32xbf16, #tpu.memory_space<vmem>>, vector<1x4x32xbf16>
    %202 = vector.shape_cast %201 : vector<1x4x32xbf16> to vector<4x32xbf16>
    %cst_237 = arith.constant dense<0.000000e+00> : vector<20x32xf32>
    %203 = tpu.matmul %200, %202, %cst_237 {dimension_numbers = #tpu.dot_dimension_numbers<[1], [0], [0], [1], [0, 0, 1, 1], [], []>} : vector<20x4xbf16>, vector<4x32xbf16>, vector<20x32xf32> -> vector<20x32xf32>
    %204 = arith.addf %198, %203 : vector<20x32xf32>
    %c0_238 = arith.constant 0 : index
    %c4_239 = arith.constant 4 : index
    %c6_240 = arith.constant 6 : index
    %c0_241 = arith.constant 0 : index
    %205 = vector.load %arg1[%c0_238, %c4_239, %c6_240, %c0_241] : memref<1x16x30x4xbf16, #tpu.memory_space<vmem>>, vector<1x1x20x4xbf16>
    %206 = vector.shape_cast %205 : vector<1x1x20x4xbf16> to vector<20x4xbf16>
    %c34 = arith.constant 34 : index
    %c0_242 = arith.constant 0 : index
    %c0_243 = arith.constant 0 : index
    %207 = vector.load %arg2[%c34, %c0_242, %c0_243] : memref<36x4x32xbf16, #tpu.memory_space<vmem>>, vector<1x4x32xbf16>
    %208 = vector.shape_cast %207 : vector<1x4x32xbf16> to vector<4x32xbf16>
    %cst_244 = arith.constant dense<0.000000e+00> : vector<20x32xf32>
    %209 = tpu.matmul %206, %208, %cst_244 {dimension_numbers = #tpu.dot_dimension_numbers<[1], [0], [0], [1], [0, 0, 1, 1], [], []>} : vector<20x4xbf16>, vector<4x32xbf16>, vector<20x32xf32> -> vector<20x32xf32>
    %210 = arith.addf %204, %209 : vector<20x32xf32>
    %c0_245 = arith.constant 0 : index
    %c5_246 = arith.constant 5 : index
    %c6_247 = arith.constant 6 : index
    %c0_248 = arith.constant 0 : index
    %211 = vector.load %arg1[%c0_245, %c5_246, %c6_247, %c0_248] : memref<1x16x30x4xbf16, #tpu.memory_space<vmem>>, vector<1x1x20x4xbf16>
    %212 = vector.shape_cast %211 : vector<1x1x20x4xbf16> to vector<20x4xbf16>
    %c35 = arith.constant 35 : index
    %c0_249 = arith.constant 0 : index
    %c0_250 = arith.constant 0 : index
    %213 = vector.load %arg2[%c35, %c0_249, %c0_250] : memref<36x4x32xbf16, #tpu.memory_space<vmem>>, vector<1x4x32xbf16>
    %214 = vector.shape_cast %213 : vector<1x4x32xbf16> to vector<4x32xbf16>
    %cst_251 = arith.constant dense<0.000000e+00> : vector<20x32xf32>
    %215 = tpu.matmul %212, %214, %cst_251 {dimension_numbers = #tpu.dot_dimension_numbers<[1], [0], [0], [1], [0, 0, 1, 1], [], []>} : vector<20x4xbf16>, vector<4x32xbf16>, vector<20x32xf32> -> vector<20x32xf32>
    %216 = arith.addf %210, %215 : vector<20x32xf32>
    %c0_252 = arith.constant 0 : index
    %c0_253 = arith.constant 0 : index
    %217 = vector.load %arg3[%c0_252, %c0_253] : memref<1x32xf32, #tpu.memory_space<vmem>>, vector<1x32xf32>
    %218 = vector.broadcast %217 : vector<1x32xf32> to vector<20x32xf32>
    %219 = arith.addf %216, %218 : vector<20x32xf32>
    %cst_254 = arith.constant 0.000000e+00 : f32
    %220 = vector.broadcast %cst_254 : f32 to vector<20x32xf32>
    %221 = arith.maximumf %219, %220 : vector<20x32xf32>
    %222 = arith.truncf %221 : vector<20x32xf32> to vector<20x32xbf16>
    %c0_255 = arith.constant 0 : index
    %c0_256 = arith.constant 0 : index
    %c0_257 = arith.constant 0 : index
    %223 = vector.load %arg4[%c0_255, %c0_256, %c0_257] : memref<1x20x32xbf16, #tpu.memory_space<vmem>>, vector<1x20x32xbf16>
    %224 = vector.shape_cast %223 : vector<1x20x32xbf16> to vector<20x32xbf16>
    %225 = vector.shape_cast %222 : vector<20x32xbf16> to vector<1x20x32xbf16>
    tpu.vector_store %arg4[%c0_255, %c0_256, %c0_257], %225 {strides = array<i32>} : memref<1x20x32xbf16, #tpu.memory_space<vmem>>, vector<1x20x32xbf16>,
    return
  }
  func.func @transform_0(%arg0: i32) -> (i32, i32, i32, i32) {
    %c0_i32 = arith.constant 0 : i32
    %c0_i32_0 = arith.constant 0 : i32
    %c0_i32_1 = arith.constant 0 : i32
    %c0_i32_2 = arith.constant 0 : i32
    return %arg0, %c0_i32, %c0_i32_0, %c0_i32_1 : i32, i32, i32, i32
  }
  func.func @transform_1(%arg0: i32) -> (i32, i32, i32) {
    %c0_i32 = arith.constant 0 : i32
    %c0_i32_0 = arith.constant 0 : i32
    %c0_i32_1 = arith.constant 0 : i32
    %c0_i32_2 = arith.constant 0 : i32
    return %c0_i32, %c0_i32_0, %c0_i32_1 : i32, i32, i32
  }
  func.func @transform_2(%arg0: i32) -> (i32, i32) {
    %c0_i32 = arith.constant 0 : i32
    %c0_i32_0 = arith.constant 0 : i32
    %c0_i32_1 = arith.constant 0 : i32
    return %c0_i32, %c0_i32_0 : i32, i32
  }
  func.func @transform_3(%arg0: i32) -> (i32, i32, i32) {
    %c0_i32 = arith.constant 0 : i32
    %c0_i32_0 = arith.constant 0 : i32
    %c0_i32_1 = arith.constant 0 : i32
    return %arg0, %c0_i32, %c0_i32_0 : i32, i32, i32
  }
}

</mosaic_0001>

<bundles_post_ra>
// kernel: tpu_custom_call.1
= control target key start
LH: loop header
LB: loop body
LE: loop exit
PB: predicated region body
PF: predicated region fallthrough
CT: control target
= control target key end

     0   :  { %s3824_s12 = smov 0   ;;  %s4230_s0 = inlined_call_operand.vmem [shape: bf16[2,16,30,4], index: 0, kind: input, shape index: {}]   ;;  %s4231_s1 = inlined_call_operand.vmem [shape: bf16[36,4,32], index: 1, kind: input, shape index: {}]   ;;  %s4232_s2 = inlined_call_operand.vmem [shape: f32[1,32], index: 2, kind: input, shape index: {}]   ;;  %s4233_s3 = inlined_call_operand.vmem [shape: bf16[2,20,32], index: 3, kind: output, shape index: {}]  }
   0x1 LB: > { %s3099_s13 = sadd.s32 4294967295, %s3802_s12   ;;  %p3103_p0 = scmp.ge.s32.totalorder %s3802_s12, 1  ;;  %s3802_s12 = sphi %s3824_s12, %s13_s12  }
   0x2   : > { %p137_p1 = scmp.lt.s32.totalorder %s3802_s12, 3 }
   0x4   : > { %p138_p2 = pnand %p3103_p0, %p137_p1 }
   0x5   : > { %v3110_v0 = vld [vmem:[%s4231_s1 + $0x2] sm:$0x3] (!%p138_p2)  ;;  %vm197_vm0 = vcmask (!%p138_p2), 1041408   ;;  %v175_v1 = vld [vmem:[%s4231_s1] sm:$0x3] (!%p138_p2)  ;;  %p161_p3 = scmp.lt.s32.totalorder (!%p138_p2), %s3099_s13, 1 }
   0x6   : > { %141 = sbr.rel (%p138_p2) target bundleno = 380 (0x17c), region = 32  ;;  %3691 = vmatprep.subr.msk.bf16.mxu0 (!%p138_p2), %vm197_vm0, %v3110_v0  ;;  %v199_v2 = vsel (!%p138_p2), %vm197_vm0, %v3110_v0, 0  ;;  %3692 = vmatprep.subr.msk.bf16.mxu1 (!%p138_p2), %vm197_vm0, %v175_v1  ;;  %v264_v3 = vsel (!%p138_p2), %vm197_vm0, %v175_v1, 0  ;;  %v3122_v4 = vld [vmem:[%s4231_s1 + $0x4] sm:$0x3] (!%p138_p2)  ;;  %vm190_vm1 = vcmask (!%p138_p2), 31744  }
   0x7   : > { %3476 = vmatpush3.bf16.msra.mxu0 (!%p138_p2), %v199_v2  ;;  %3482 = vmatpush3.bf16.msra.mxu1 (!%p138_p2), %v264_v3  ;;  %v3130_v5 = vld [vmem:[%s4231_s1 + $0x6] sm:$0x3] (!%p138_p2)  ;;  %v335_v8 = vsel (!%p138_p2), %vm197_vm0, %v3122_v4, 0  ;;  %v3135_v14 = vld [vmem:[%s4231_s1 + $0x8] sm:$0x3] (!%p138_p2)  ;;  %vm2370_vm4 = vcmask (!%p138_p2), 1044480  }
   0x8   : > { %3693 = vmatprep.subr.msk.bf16.mxu0 (!%p138_p2), %vm197_vm0, %v3122_v4  ;;  %3694 = vmatprep.subr.msk.bf16.mxu1 (!%p138_p2), %vm197_vm0, %v3130_v5  ;;  %v409_v9 = vsel (!%p138_p2), %vm197_vm0, %v3130_v5, 0  ;;  %vm468_vm2 = vsmask.f32 (!%p138_p2), 7424  ;;  %v3140_v17 = vld [vmem:[%s4231_s1 + $0xa] sm:$0x3] (!%p138_p2)  ;;  %v490_v28 = vsel (!%p138_p2), %vm197_vm0, %v3135_v14, 0 }
   0x9   : > { %v570_v31 = vsel (!%p138_p2), %vm197_vm0, %v3140_v17, 0  ;;  %v3147_v33 = vld [vmem:[%s4231_s1 + $0xc] sm:$0x3] (!%p138_p2)  ;;  %v3155_v36 = vld [vmem:[%s4231_s1 + $0xe] sm:$0x3] (!%p138_p2)  ;;  %vm3042_vm5 = vcmask (!%p138_p2), 254976  }
   0xa   : > { %v644_v42 = vsel (!%p138_p2), %vm197_vm0, %v3147_v33, 0  ;;  %v718_v44 = vsel (!%p138_p2), %vm197_vm0, %v3155_v36, 0  ;;  %v3163_v46 = vld [vmem:[%s4231_s1 + $0x10] sm:$0x3] (!%p138_p2)  ;;  %v3171_v47 = vld [vmem:[%s4231_s1 + $0x12] sm:$0x3] (!%p138_p2) }
   0xb   : > { %v792_v54 = vsel (!%p138_p2), %vm197_vm0, %v3163_v46, 0  ;;  %v866_v55 = vsel (!%p138_p2), %vm197_vm0, %v3171_v47, 0  ;;  %v3177_v59 = vld [vmem:[%s4231_s1 + $0x14] sm:$0x3] (!%p138_p2)  ;;  %v3182_v1 = vld [vmem:[%s4231_s1 + $0x16] sm:$0x3] (!%p138_p2) }
   0xc   : > { %vm2007_vm3 = vsmask.f32 (!%p138_p2), 5376  ;;  %vm3039_vm6 = vcmask (!%p138_p2), 257024  }
   0xd   : > { %s4235_s13 = smov (!%p161_p3, %s3099_s13), 1 }
   0xe   : > { %s3363_s22 = sshll.u32 %s4235_s13, 8  ;;  %s3727_s18 = smul.u32 12, %s4235_s13 }
   0xf   : > { %s3856_s25 = scalar_lea.vmem %s4230_s0, %s3363_s22 }
  0x10   : > { %v3736_v6 = vld [vmem:[%s3856_s25 + $0x10] sm:$0xff]   ;;  %v3737_v7 = vld [vmem:[%s3856_s25] sm:$0xff]   ;;  %v3738_v12 = vld [vmem:[%s3856_s25 + $0x18] ss:$0 sps:$4 sm:$0x33]   ;;  %s170_s21 = scalar_lea.vmem %s4233_s3, %s3727_s18 }
  0x11   : > { %3477 = vmatprep.mubr.msk.bf16.mxu0 %vm190_vm1, %v3736_v6  ;;  %v551_v10 = vshll.u32 %v3736_v6, 16  ;;  %3483 = vmatprep.mubr.msk.bf16.mxu1 %vm190_vm1, %v3737_v7  ;;  %v471_v11 = vshll.u32 %v3737_v7, 16  ;;  %v3740_v13 = vld [vmem:[%s3856_s25 + $0x20] sm:$0xff]   ;;  %v469_v15 = vshrl.u32 %v3737_v7, 16  ;;  %v3741_v19 = vld [vmem:[%s3856_s25 + $0x30] sm:$0xff]   ;;  %v549_v20 = vshrl.u32 %v3736_v6, 16 }
  0x12   : > { %v3739_v16 = vld [vmem:[%s3856_s25 + $0x8] ss:$0 sps:$4 sm:$0x33]   ;;  %3478 = vmatmul.mubr.msk.bf16.vlgmr.msra.gmra.mrb[0].mxu0 %vm190_vm1, %v3738_v12  ;;  %v3743_v23 = vld [vmem:[%s3856_s25 + $0x38] ss:$0 sps:$4 sm:$0x33]  }
  0x13   : > { %v473_v18 = vrot.slane %v471_v11, 1  ;;  %3484 = vmatmul.mubr.msk.bf16.vlgmr.msra.gmra.mrb[0].mxu1 %vm190_vm1, %v3739_v16  ;;  %3488 = vmatpush3.bf16.msra.mxu0 %v335_v8  ;;  %v553_v21 = vrot.slane %v551_v10, 1  ;;  %v3742_v22 = vld [vmem:[%s3856_s25 + $0x28] ss:$0 sps:$4 sm:$0x33]   ;;  %v3746_v43 = vld [vmem:[%s3856_s25 + $0x40] sm:$0xff]  }
  0x14   : > { %3494 = vmatpush3.bf16.msra.mxu1 %v409_v9  ;;  %3489 = vmatprep.mubr.msk.bf16.mxu0 %vm190_vm1, %v3740_v13  ;;  %v3744_v24 = vld [vmem:[%s3856_s25 + $0x8] ss:$0 sps:$4 sm:$0x77]   ;;  %v3745_v25 = vld [vmem:[%s3856_s25 + $0x18] ss:$0 sps:$4 sm:$0x77]  }
  0x15   : > { %3495 = vmatprep.mubr.msk.bf16.mxu1 %vm190_vm1, %v3741_v19  ;;  %3695 = vmatprep.subr.msk.bf16.mxu0 %vm197_vm0, %v3135_v14  ;;  %v474_v26 = vor.u32 %v473_v18, %v469_v15  ;;  %v476_v27 = vshll.u32 %v3744_v24, 16  ;;  %v554_v29 = vor.u32 %v553_v21, %v549_v20  ;;  %v556_v30 = vshll.u32 %v3745_v25, 16  ;;  %v3747_v45 = vld [vmem:[%s3856_s25 + $0x50] sm:$0xff]   ;;  %v3748_v48 = vld [vmem:[%s3856_s25 + $0x48] ss:$0 sps:$4 sm:$0x33]  }
  0x16   : > { %3696 = vmatprep.subr.msk.bf16.mxu1 %vm197_vm0, %v3140_v17  ;;  %v480_v34 = vshrl.u32 %v3744_v24, 16  ;;  %v560_v38 = vshrl.u32 %v3745_v25, 16  ;;  %v927_v49 = vshll.u32 %v3746_v43, 16  ;;  %v3749_v50 = vld [vmem:[%s3856_s25 + $0x58] ss:$0 sps:$4 sm:$0x33]  }
  0x17   : > { %v478_v32 = vrot.slane %v476_v27, 1  ;;  %v558_v35 = vrot.slane %v556_v30, 1  ;;  %v3754_v51 = vld [vmem:[%s3856_s25 + $0x48] ss:$0 sps:$4 sm:$0x77]   ;;  %v1007_v53 = vshll.u32 %v3747_v45, 16 }
  0x18   : > { %v3755_v52 = vld [vmem:[%s3856_s25 + $0x58] ss:$0 sps:$4 sm:$0x77]   ;;  %v3750_v56 = vld [vmem:[%s3856_s25 + $0x60] sm:$0xff]   ;;  %v925_v57 = vshrl.u32 %v3746_v43, 16  ;;  %v3751_v58 = vld [vmem:[%s3856_s25 + $0x70] sm:$0xff]  }
  0x19   : > { %v479_v37 = vsel %vm468_vm2, %v474_v26, %v478_v32  ;;  %v559_v39 = vsel %vm468_vm2, %v554_v29, %v558_v35  ;;  %v482_v40 = vor.u32 %v480_v34, %v478_v32  ;;  %v562_v41 = vor.u32 %v560_v38, %v558_v35  ;;  %v3752_v4 = vld [vmem:[%s3856_s25 + $0x68] ss:$0 sps:$4 sm:$0x33]   ;;  %v3753_v7 = vld [vmem:[%s3856_s25 + $0x78] ss:$0 sps:$4 sm:$0x33]  }
  0x1a   : > { %3490 = vmatmul.mubr.msk.bf16.vlgmr.msra.gmra.mrb[4].mxu0 %vm190_vm1, %v3742_v22  ;;  %v929_v60 = vrot.slane %v927_v49, 1  ;;  %v932_v61 = vshll.u32 %v3754_v51, 16  ;;  %v1005_v62 = vshrl.u32 %v3747_v45, 16  ;;  %v1009_v63 = vrot.slane %v1007_v53, 1  ;;  %v3189_v12 = vld [vmem:[%s4231_s1 + $0x18] sm:$0x3] }
  0x1b   : > { %3496 = vmatmul.mubr.msk.bf16.vlgmr.msra.gmra.mrb[4].mxu1 %vm190_vm1, %v3743_v23  ;;  %3500 = vmatpush3.bf16.msra.mxu0 %v490_v28  ;;  %v1012_v0 = vshll.u32 %v3755_v52, 16  ;;  %v946_v8 = vsel %vm197_vm0, %v3177_v59, 0  ;;  %v1026_v9 = vsel %vm197_vm0, %v3182_v1, 0  ;;  %v936_v10 = vshrl.u32 %v3754_v51, 16  ;;  %v3197_v14 = vld [vmem:[%s4231_s1 + $0x1a] sm:$0x3] }
  0x1c   : > { %3506 = vmatpush3.bf16.msra.mxu1 %v570_v31  ;;  %3501 = vmatprep.mubr.msk.bf16.mxu0 %vm190_vm1, %v479_v37  ;;  %v930_v2 = vor.u32 %v929_v60, %v925_v57  ;;  %v934_v3 = vrot.slane %v932_v61, 1  ;;  %v1010_v5 = vor.u32 %v1009_v63, %v1005_v62  ;;  %v1016_v15 = vshrl.u32 %v3755_v52, 16  ;;  %v3756_v19 = vld [vmem:[%s3856_s25 + $0x80] sm:$0xff]   ;;  %v3757_v21 = vld [vmem:[%s3856_s25 + $0x90] sm:$0xff]   ;;  %v3205_v22 = vld [vmem:[%s4231_s1 + $0x1c] sm:$0x3] }
  0x1d   : > { %3507 = vmatprep.mubr.msk.bf16.mxu1 %vm190_vm1, %v559_v39  ;;  %3697 = vmatprep.subr.msk.bf16.mxu0 %vm197_vm0, %v3147_v33  ;;  %v1014_v6 = vrot.slane %v1012_v0, 1  ;;  %v1100_v18 = vsel %vm197_vm0, %v3189_v12, 0  ;;  %v1174_v20 = vsel %vm197_vm0, %v3197_v14, 0  ;;  %v3213_v23 = vld [vmem:[%s4231_s1 + $0x1e] sm:$0x3]  ;;  %v1383_v26 = vshll.u32 %v3756_v19, 16 }
  0x1e   : > { %3698 = vmatprep.subr.msk.bf16.mxu1 %vm197_vm0, %v3155_v36  ;;  %v935_v11 = vsel %vm468_vm2, %v930_v2, %v934_v3  ;;  %v938_v16 = vor.u32 %v936_v10, %v934_v3  ;;  %v3758_v24 = vld [vmem:[%s3856_s25 + $0x88] ss:$0 sps:$4 sm:$0x33]   ;;  %v3765_v27 = vld [vmem:[%s3856_s25 + $0x98] ss:$0 sps:$4 sm:$0x77]  }
  0x1f   : > { %v1015_v13 = vsel %vm468_vm2, %v1010_v5, %v1014_v6  ;;  %v1018_v17 = vor.u32 %v1016_v15, %v1014_v6  ;;  %v3764_v25 = vld [vmem:[%s3856_s25 + $0x88] ss:$0 sps:$4 sm:$0x77]   ;;  %v1463_v28 = vshll.u32 %v3757_v21, 16  ;;  %v1248_v30 = vsel %vm197_vm0, %v3205_v22, 0  ;;  %v3760_v32 = vld [vmem:[%s3856_s25 + $0xa0] sm:$0xff]  }
  0x20   : > { %v3759_v29 = vld [vmem:[%s3856_s25 + $0x98] ss:$0 sps:$4 sm:$0x33]   ;;  %v1322_v31 = vsel %vm197_vm0, %v3213_v23, 0  ;;  %v3219_v33 = vld [vmem:[%s4231_s1 + $0x20] sm:$0x3] }
  0x21   : > { %v3761_v34 = vld [vmem:[%s3856_s25 + $0xb0] sm:$0xff]   ;;  %v1381_v35 = vshrl.u32 %v3756_v19, 16  ;;  %v1385_v36 = vrot.slane %v1383_v26, 1  ;;  %v1388_v37 = vshll.u32 %v3764_v25, 16  ;;  %v1461_v38 = vshrl.u32 %v3757_v21, 16  ;;  %v3766_v60 = vld [vmem:[%s3856_s25 + $0xc0] sm:$0xff]  }
  0x22   : > { %3502 = vmatmul.mubr.msk.bf16.vlgmr.msra.gmra.mrb[8].mxu0 %vm190_vm1, %v482_v40  ;;  %v1465_v39 = vrot.slane %v1463_v28, 1  ;;  %v1468_v40 = vshll.u32 %v3765_v27, 16  ;;  %v1392_v51 = vshrl.u32 %v3764_v25, 16  ;;  %v3231_v53 = vld [vmem:[%s4231_s1 + $0x24] sm:$0x3]  ;;  %v3767_v62 = vld [vmem:[%s3856_s25 + $0xd0] sm:$0xff]  }
  0x23   : > { %3508 = vmatmul.mubr.msk.bf16.vlgmr.msra.gmra.mrb[8].mxu1 %vm190_vm1, %v562_v41  ;;  %3512 = vmatpush3.bf16.msra.mxu0 %v644_v42  ;;  %v3224_v41 = vld [vmem:[%s4231_s1 + $0x22] sm:$0x3]  ;;  %v3762_v42 = vld [vmem:[%s3856_s25 + $0xa8] ss:$0 sps:$4 sm:$0x33]   ;;  %v3771_v15 = vld [vmem:[%s3856_s25 + $0xf0] sm:$0xff]  }
  0x24   : > { %3518 = vmatpush3.bf16.msra.mxu1 %v718_v44  ;;  %3513 = vmatprep.mubr.msk.bf16.mxu0 %vm190_vm1, %v3746_v43  ;;  %v1386_v43 = vor.u32 %v1385_v36, %v1381_v35  ;;  %v1390_v44 = vrot.slane %v1388_v37, 1  ;;  %v1482_v49 = vsel %vm197_vm0, %v3224_v41, 0  ;;  %v3247_v61 = vld [vmem:[%s4231_s1 + $0x28] sm:$0x3]  ;;  %v3255_v63 = vld [vmem:[%s4231_s1 + $0x2a] sm:$0x3] }
  0x25   : > { %3519 = vmatprep.mubr.msk.bf16.mxu1 %vm190_vm1, %v3747_v45  ;;  %3699 = vmatprep.subr.msk.bf16.mxu0 %vm197_vm0, %v3163_v46  ;;  %v1466_v45 = vor.u32 %v1465_v39, %v1461_v38  ;;  %v1470_v46 = vrot.slane %v1468_v40, 1  ;;  %v4019_v0 = vld [vmem:[%s3856_s25 + $0xc8] ss:$0 sps:$4 sm:$0x77]   ;;  %v1991_v2 = vld [vmem:[%s3856_s25] sm:$0xc] }
  0x26   : > { %3700 = vmatprep.subr.msk.bf16.mxu1 %vm197_vm0, %v3171_v47  ;;  %v3763_v47 = vld [vmem:[%s3856_s25 + $0xb8] ss:$0 sps:$4 sm:$0x33]   ;;  %v4025_v3 = vld [vmem:[%s3856_s25 + $0x4] sm:$0xf]  ;;  %v1704_v10 = vsel %vm197_vm0, %v3247_v61, 0 }
  0x27   : > { %v1471_v52 = vsel %vm468_vm2, %v1466_v45, %v1470_v46  ;;  %v3768_v5 = vld [vmem:[%s3856_s25 + $0xc8] ss:$0 sps:$4 sm:$0x33]   ;;  %v4031_v6 = vld [vmem:[%s3856_s25 + $0x14] sm:$0xf]  ;;  %v1848_v39 = vshrl.u32 %v4019_v0, 16 }
  0x28   : > { %v3266_v25 = vld [vmem:[%s4231_s1 + $0x2e] sm:$0x3]  ;;  %v3773_v37 = vld [vmem:[%s3856_s25 + $0xf8] ss:$0 sps:$4 sm:$0x33]  }
  0x2a   : > { %3514 = vmatmul.mubr.msk.bf16.vlgmr.msra.gmra.mrb[12].mxu0 %vm190_vm1, %v3748_v48  ;;  %v1402_v48 = vsel %vm197_vm0, %v3219_v33, 0 }
  0x2b   : > { %3520 = vmatmul.mubr.msk.bf16.vlgmr.msra.gmra.mrb[12].mxu1 %vm190_vm1, %v3749_v50  ;;  %3524 = vmatpush3.bf16.msra.mxu0 %v792_v54  ;;  %v1391_v50 = vsel %vm468_vm2, %v1386_v43, %v1390_v44  ;;  %v1472_v54 = vshrl.u32 %v3765_v27, 16 }
  0x2c   : > { %3530 = vmatpush3.bf16.msra.mxu1 %v866_v55  ;;  %3525 = vmatprep.mubr.msk.bf16.mxu0 %vm190_vm1, %v3750_v56  ;;  %v3239_v55 = vld [vmem:[%s4231_s1 + $0x26] sm:$0x3]  ;;  %v1394_v56 = vor.u32 %v1392_v51, %v1390_v44 }
  0x2d   : > { %3531 = vmatprep.mubr.msk.bf16.mxu1 %vm190_vm1, %v3751_v58  ;;  %3701 = vmatprep.subr.msk.bf16.mxu0 %vm197_vm0, %v3177_v59  ;;  %v1474_v57 = vor.u32 %v1472_v54, %v1470_v46  ;;  %v1556_v58 = vsel %vm197_vm0, %v3231_v53, 0  ;;  %v1630_v59 = vsel %vm197_vm0, %v3239_v55, 0 }
  0x2e   : > { %3702 = vmatprep.subr.msk.bf16.mxu1 %vm197_vm0, %v3182_v1  ;;  %v1839_v1 = vshll.u32 %v3766_v60, 16 }
  0x32   : > { %3526 = vmatmul.mubr.msk.bf16.vlgmr.msra.gmra.mrb[16].mxu0 %vm190_vm1, %v3752_v4  ;;  %v3275_v4 = vld [vmem:[%s3856_s25 + $0x10] sm:$0xc] }
  0x33   : > { %3532 = vmatmul.mubr.msk.bf16.vlgmr.msra.gmra.mrb[16].mxu1 %vm190_vm1, %v3753_v7  ;;  %3536 = vmatpush3.bf16.msra.mxu0 %v946_v8  ;;  %v3769_v7 = vld [vmem:[%s3856_s25 + $0xd8] ss:$0 sps:$4 sm:$0x33]  }
  0x34   : > { %3542 = vmatpush3.bf16.msra.mxu1 %v1026_v9  ;;  %3537 = vmatprep.mubr.msk.bf16.mxu0 %vm190_vm1, %v935_v11  ;;  %v4037_v8 = vld [vmem:[%s3856_s25 + $0xd8] ss:$0 sps:$4 sm:$0x77]   ;;  %v1919_v9 = vshll.u32 %v3767_v62, 16  ;;  %v3770_v11 = vld [vmem:[%s3856_s25 + $0xe0] sm:$0xff]  }
  0x35   : > { %3543 = vmatprep.mubr.msk.bf16.mxu1 %vm190_vm1, %v1015_v13  ;;  %3703 = vmatprep.subr.msk.bf16.mxu0 %vm197_vm0, %v3189_v12  ;;  %v3271_v12 = vcombine.low %v1991_v2, %v4025_v3  ;;  %v4044_v13 = vld [vmem:[%s3856_s25 + $0x8] sm:$0x1f]  }
  0x36   : > { %3704 = vmatprep.subr.msk.bf16.mxu1 %vm197_vm0, %v3197_v14  ;;  %v1778_v14 = vsel %vm197_vm0, %v3255_v63, 0  ;;  %v2017_v28 = vshrl.u32 %v4044_v13, 16 }
  0x37   : > { %v2009_v26 = vshrl.u32 %v3271_v12, 16  ;;  %v2012_v27 = vshll.u32 %v3271_v12, 16 }
  0x38   : > { %v2019_v44 = vrot.slane %v2017_v28, 2  ;;  %v3311_v28 = vld [vmem:[%s3856_s25 + $0x40] sm:$0xc] }
  0x39   : > { %v2014_v43 = vrot.slane %v2012_v27, 3  ;;  %v3297_v27 = vld [vmem:[%s4231_s1 + $0x36] sm:$0x3] }
  0x3a   : > { %3538 = vmatmul.mubr.msk.bf16.vlgmr.msra.gmra.mrb[20].mxu0 %vm190_vm1, %v938_v16  ;;  %v1837_v16 = vshrl.u32 %v3766_v60, 16 }
  0x3b   : > { %3544 = vmatmul.mubr.msk.bf16.vlgmr.msra.gmra.mrb[20].mxu1 %vm190_vm1, %v1018_v17  ;;  %3548 = vmatpush3.bf16.msra.mxu0 %v1100_v18  ;;  %v1844_v17 = vshll.u32 %v4019_v0, 16  ;;  %v3280_v18 = vcombine.low %v3275_v4, %v4031_v6 }
  0x3c   : > { %3554 = vmatpush3.bf16.msra.mxu1 %v1174_v20  ;;  %3549 = vmatprep.mubr.msk.bf16.mxu0 %vm190_vm1, %v3756_v19  ;;  %v3261_v19 = vld [vmem:[%s4231_s1 + $0x2c] sm:$0x3]  ;;  %v1841_v20 = vrot.slane %v1839_v1, 1 }
  0x3d   : > { %3555 = vmatprep.mubr.msk.bf16.mxu1 %vm190_vm1, %v3757_v21  ;;  %3705 = vmatprep.subr.msk.bf16.mxu0 %vm197_vm0, %v3205_v22  ;;  %v1917_v21 = vshrl.u32 %v3767_v62, 16  ;;  %v4054_v22 = vld [vmem:[%s3856_s25 + $0x18] sm:$0x1f]   ;;  %v1846_v36 = vrot.slane %v1844_v17, 1  ;;  %v1858_v38 = vsel %vm197_vm0, %v3261_v19, 0 }
  0x3e   : > { %3706 = vmatprep.subr.msk.bf16.mxu1 %vm197_vm0, %v3213_v23  ;;  %v1921_v23 = vrot.slane %v1919_v9, 1  ;;  %v1842_v35 = vor.u32 %v1841_v20, %v1837_v16 }
  0x40   : > { %v1922_v40 = vor.u32 %v1921_v23, %v1917_v21  ;;  %v1847_v51 = vsel %vm468_vm2, %v1842_v35, %v1846_v36  ;;  %v3288_v21 = vld [vmem:[%s4231_s1 + $0x34] sm:$0x3] }
  0x42   : > { %3550 = vmatmul.mubr.msk.bf16.vlgmr.msra.gmra.mrb[24].mxu0 %vm190_vm1, %v3758_v24  ;;  %v1924_v24 = vshll.u32 %v4037_v8, 16 }
  0x43   : > { %3556 = vmatmul.mubr.msk.bf16.vlgmr.msra.gmra.mrb[24].mxu1 %vm190_vm1, %v3759_v29  ;;  %3560 = vmatpush3.bf16.msra.mxu0 %v1248_v30  ;;  %v2020_v29 = vshll.u32 %v4044_v13, 16  ;;  %v2102_v30 = vshrl.u32 %v3280_v18, 16 }
  0x44   : > { %3566 = vmatpush3.bf16.msra.mxu1 %v1322_v31  ;;  %3561 = vmatprep.mubr.msk.bf16.mxu0 %vm190_vm1, %v3760_v32  ;;  %v2105_v31 = vshll.u32 %v3280_v18, 16  ;;  %v2110_v32 = vshrl.u32 %v4054_v22, 16 }
  0x45   : > { %3567 = vmatprep.mubr.msk.bf16.mxu1 %vm190_vm1, %v3761_v34  ;;  %3707 = vmatprep.subr.msk.bf16.mxu0 %vm197_vm0, %v3219_v33  ;;  %v2113_v33 = vshll.u32 %v4054_v22, 16  ;;  %v3772_v34 = vld [vmem:[%s3856_s25 + $0xe8] ss:$0 sps:$4 sm:$0x33]   ;;  %v2022_v45 = vrot.slane %v2020_v29, 3  ;;  %v2104_v46 = vrot.slane %v2102_v30, 2 }
  0x46   : > { %3708 = vmatprep.subr.msk.bf16.mxu1 %vm197_vm0, %v3224_v41  ;;  %v1926_v41 = vrot.slane %v1924_v24, 1  ;;  %v4109_v29 = vld [vmem:[%s3856_s25 + $0x44] sm:$0xf] }
  0x48   : > { %v1927_v54 = vsel %vm468_vm2, %v1922_v40, %v1926_v41  ;;  %v2218_v40 = vsel %vm197_vm0, %v3288_v21, 0 }
  0x4a   : > { %3562 = vmatmul.mubr.msk.bf16.vlgmr.msra.gmra.mrb[28].mxu0 %vm190_vm1, %v3762_v42  ;;  %v2011_v42 = vrot.slane %v2009_v26, 2 }
  0x4b   : > { %3568 = vmatmul.mubr.msk.bf16.vlgmr.msra.gmra.mrb[28].mxu1 %vm190_vm1, %v3763_v47  ;;  %3572 = vmatpush3.bf16.msra.mxu0 %v1402_v48  ;;  %v2107_v47 = vrot.slane %v2105_v31, 3  ;;  %v2112_v48 = vrot.slane %v2110_v32, 2  ;;  %v3320_v32 = vld [vmem:[%s3856_s25 + $0x50] sm:$0xc] }
  0x4c   : > { %3578 = vmatpush3.bf16.msra.mxu1 %v1482_v49  ;;  %3573 = vmatprep.mubr.msk.bf16.mxu0 %vm190_vm1, %v1391_v50  ;;  %v2115_v49 = vrot.slane %v2113_v33, 3  ;;  %v1938_v50 = vsel %vm197_vm0, %v3266_v25, 0  ;;  %v4115_v33 = vld [vmem:[%s3856_s25 + $0x54] sm:$0xf] }
  0x4d   : > { %3579 = vmatprep.mubr.msk.bf16.mxu1 %vm190_vm1, %v1471_v52  ;;  %3709 = vmatprep.subr.msk.bf16.mxu0 %vm197_vm0, %v3231_v53  ;;  %v3780_v52 = vld [vmem:[%s3856_s25 + $0x20] sm:$0xfc]   ;;  %v3781_v53 = vld [vmem:[%s3856_s25 + $0x28] sm:$0x1f]  }
  0x4e   : > { %3710 = vmatprep.subr.msk.bf16.mxu1 %vm197_vm0, %v3239_v55  ;;  %v3270_v55 = vld [vmem:[%s4231_s1 + $0x30] sm:$0x3]  ;;  %v2116_v0 = vor.u32 %v2115_v49, %v2112_v48  ;;  %v2195_v1 = vshrl.u32 %v3780_v52, 16  ;;  %v2198_v2 = vshll.u32 %v3780_v52, 16  ;;  %v2203_v4 = vshrl.u32 %v3781_v53, 16 }
  0x4f   : > { %v2032_v12 = vsel %vm197_vm0, %v3270_v55, 0  ;;  %v3307_v49 = vld [vmem:[%s4231_s1 + $0x3a] sm:$0x3] }
  0x50   : > { %v2197_v17 = vrot.slane %v2195_v1, 2  ;;  %v2200_v18 = vrot.slane %v2198_v2, 3 }
  0x52   : > { %3574 = vmatmul.mubr.msk.bf16.vlgmr.msra.gmra.mrb[32].mxu0 %vm190_vm1, %v1394_v56  ;;  %v3782_v56 = vld [vmem:[%s3856_s25 + $0x30] sm:$0xfc]   ;;  %v2201_v30 = vor.u32 %v2200_v18, %v2197_v17 }
  0x53   : > { %3580 = vmatmul.mubr.msk.bf16.vlgmr.msra.gmra.mrb[32].mxu1 %vm190_vm1, %v1474_v57  ;;  %3584 = vmatpush3.bf16.msra.mxu0 %v1556_v58  ;;  %v3783_v57 = vld [vmem:[%s3856_s25 + $0x38] sm:$0x1f]   ;;  %v1850_v58 = vor.u32 %v1848_v39, %v1846_v36  ;;  %v2364_v36 = vld [vmem:[%s3856_s25] sm:$0x8]  ;;  %v4122_v39 = vld [vmem:[%s3856_s25 + $0x48] sm:$0x1f]  }
  0x54   : > { %3590 = vmatpush3.bf16.msra.mxu1 %v1630_v59  ;;  %3585 = vmatprep.mubr.msk.bf16.mxu0 %vm190_vm1, %v3766_v60  ;;  %v1928_v59 = vshrl.u32 %v4037_v8, 16  ;;  %v3279_v60 = vld [vmem:[%s4231_s1 + $0x32] sm:$0x3]  ;;  %v2291_v8 = vshll.u32 %v3782_v56, 16  ;;  %v2296_v9 = vshrl.u32 %v3783_v57, 16  ;;  %v2531_v52 = vshll.u32 %v4122_v39, 16 }
  0x55   : > { %3591 = vmatprep.mubr.msk.bf16.mxu1 %vm190_vm1, %v3767_v62  ;;  %3711 = vmatprep.subr.msk.bf16.mxu0 %vm197_vm0, %v3247_v61  ;;  %v2015_v61 = vor.u32 %v2014_v43, %v2011_v42  ;;  %v2023_v62 = vor.u32 %v2022_v45, %v2019_v44  ;;  %v4127_v42 = vld [vmem:[%s3856_s25 + $0x58] sm:$0x1f]   ;;  %v2311_v43 = vsel %vm197_vm0, %v3297_v27, 0  ;;  %v3303_v45 = vcombine.low %v2364_v36, %v4025_v3 }
  0x56   : > { %3712 = vmatprep.subr.msk.bf16.mxu1 %vm197_vm0, %v3255_v63  ;;  %v2108_v63 = vor.u32 %v2107_v47, %v2104_v46  ;;  %v2293_v24 = vrot.slane %v2291_v8, 3  ;;  %v3302_v47 = vld [vmem:[%s4231_s1 + $0x38] sm:$0x3]  ;;  %v2528_v3 = vshrl.u32 %v4122_v39, 16  ;;  %v3790_v8 = vld [vmem:[%s3856_s25 + $0x60] sm:$0xfc]  }
  0x58   : > { %v2117_v16 = vsel %vm2007_vm3, %v2108_v63, %v2116_v0  ;;  %v2530_v63 = vrot.slane %v2528_v3, 2 }
  0x5a   : > { %3586 = vmatmul.mubr.msk.bf16.vlgmr.msra.gmra.mrb[36].mxu0 %vm190_vm1, %v3768_v5  ;;  %v2206_v5 = vshll.u32 %v3781_v53, 16 }
  0x5b   : > { %3592 = vmatmul.mubr.msk.bf16.vlgmr.msra.gmra.mrb[36].mxu1 %vm190_vm1, %v3769_v7  ;;  %3596 = vmatpush3.bf16.msra.mxu0 %v1704_v10  ;;  %v2288_v7 = vshrl.u32 %v3782_v56, 16  ;;  %v2299_v10 = vshll.u32 %v3783_v57, 16  ;;  %v2371_v56 = vrot.slane %v3303_v45, 3  ;;  %v2372_v57 = vrot.slane %v4044_v13, 3  ;;  %v3342_v45 = vld [vmem:[%s4231_s1 + $0x42] sm:$0x3] }
  0x5c   : > { %3602 = vmatpush3.bf16.msra.mxu1 %v1778_v14  ;;  %3597 = vmatprep.mubr.msk.bf16.mxu0 %vm190_vm1, %v3770_v11  ;;  %v1930_v11 = vor.u32 %v1928_v59, %v1926_v41  ;;  %v2125_v14 = vsel %vm197_vm0, %v3279_v60, 0  ;;  %v2208_v20 = vrot.slane %v2206_v5, 3  ;;  %v3325_v41 = vcombine.low %v3320_v32, %v4115_v33 }
  0x5d   : > { %3603 = vmatprep.mubr.msk.bf16.mxu1 %vm190_vm1, %v3771_v15  ;;  %3713 = vmatprep.subr.msk.bf16.mxu0 %vm197_vm0, %v3261_v19  ;;  %v2024_v15 = vsel %vm2007_vm3, %v2015_v61, %v2023_v62  ;;  %v2205_v19 = vrot.slane %v2203_v4, 2  ;;  %v2290_v23 = vrot.slane %v2288_v7, 2  ;;  %v2301_v26 = vrot.slane %v2299_v10, 3  ;;  %v3315_v10 = vld [vmem:[%s4231_s1 + $0x3c] sm:$0x3] }
  0x5e   : > { %3714 = vmatprep.subr.msk.bf16.mxu1 %vm197_vm0, %v3266_v25  ;;  %v2298_v25 = vrot.slane %v2296_v9, 2  ;;  %v2613_v53 = vshrl.u32 %v3325_v41, 16  ;;  %v2450_v5 = vsel %vm197_vm0, %v3307_v49, 0  ;;  %v2373_v7 = vsel %vm2370_vm4, %v2371_v56, %v2372_v57  ;;  %v3791_v9 = vld [vmem:[%s3856_s25 + $0x68] sm:$0x1f]  }
  0x5f   : > { %v2209_v31 = vor.u32 %v2208_v20, %v2205_v19  ;;  %v2706_v19 = vshrl.u32 %v3790_v8, 16  ;;  %v2709_v20 = vshll.u32 %v3790_v8, 16 }
  0x60   : > { %v2302_v35 = vor.u32 %v2301_v26, %v2298_v25  ;;  %v2615_v1 = vrot.slane %v2613_v53, 2 }
  0x61   : > { %v2210_v44 = vsel %vm2007_vm3, %v2201_v30, %v2209_v31 }
  0x62   : > { %3598 = vmatmul.mubr.msk.bf16.vlgmr.msra.gmra.mrb[40].mxu0 %vm190_vm1, %v3772_v34  ;;  %v2294_v34 = vor.u32 %v2293_v24, %v2290_v23  ;;  %v2717_v23 = vshll.u32 %v3791_v9, 16 }
  0x63   : > { %3604 = vmatmul.mubr.msk.bf16.vlgmr.msra.gmra.mrb[40].mxu1 %vm190_vm1, %v3773_v37  ;;  %3608 = vmatpush3.bf16.msra.mxu0 %v1858_v38  ;;  %v3306_v37 = vld [vmem:[%s3856_s25 + $0x10] sm:$0x8]  ;;  %v3316_v38 = vcombine.low %v3311_v28, %v4109_v29  ;;  %v2543_v28 = vsel %vm197_vm0, %v3315_v10, 0 }
  0x64   : > { %3614 = vmatpush3.bf16.msra.mxu1 %v1938_v50  ;;  %3609 = vmatprep.mubr.msk.bf16.mxu0 %vm190_vm1, %v1847_v51  ;;  %v2303_v46 = vsel %vm2007_vm3, %v2294_v34, %v2302_v35  ;;  %v3308_v48 = vcombine.low %v3306_v37, %v4031_v6  ;;  %v2621_v6 = vshrl.u32 %v4127_v42, 16  ;;  %v2708_v34 = vrot.slane %v2706_v19, 2 }
  0x65   : > { %3615 = vmatprep.mubr.msk.bf16.mxu1 %vm190_vm1, %v1927_v54  ;;  %3715 = vmatprep.subr.msk.bf16.mxu0 %vm197_vm0, %v3270_v55  ;;  %v2520_v50 = vshrl.u32 %v3316_v38, 16  ;;  %v2523_v51 = vshll.u32 %v3316_v38, 16  ;;  %v2616_v54 = vshll.u32 %v3325_v41, 16  ;;  %v2624_v55 = vshll.u32 %v4127_v42, 16  ;;  %v3333_v38 = vld [vmem:[%s4231_s1 + $0x40] sm:$0x3] }
  0x66   : > { %3716 = vmatprep.subr.msk.bf16.mxu1 %vm197_vm0, %v3279_v60  ;;  %v2440_v59 = vrot.slane %v3308_v48, 3  ;;  %v2441_v60 = vrot.slane %v4054_v22, 3  ;;  %v2623_v4 = vrot.slane %v2621_v6, 2  ;;  %v2719_v37 = vrot.slane %v2717_v23, 3 }
  0x67   : > { %v2522_v61 = vrot.slane %v2520_v50, 2  ;;  %v2618_v2 = vrot.slane %v2616_v54, 3  ;;  %v2626_v13 = vrot.slane %v2624_v55, 3  ;;  %v3347_v50 = vld [vmem:[%s3856_s25 + $0x40] sm:$0x8]  ;;  %v2729_v3 = vsel %vm197_vm0, %v3333_v38, 0 }
  0x68   : > { %v2442_v22 = vsel %vm2370_vm4, %v2440_v59, %v2441_v60  ;;  %v3349_v54 = vcombine.low %v3347_v50, %v4109_v29  ;;  %v3348_v55 = vld [vmem:[%s4231_s1 + $0x44] sm:$0x3]  ;;  %v2951_v59 = vrot.slane %v4127_v42, 3 }
  0x69   : > { %v2619_v17 = vor.u32 %v2618_v2, %v2615_v1  ;;  %v2627_v18 = vor.u32 %v2626_v13, %v2623_v4 }
  0x6a   : > { %3610 = vmatmul.mubr.msk.bf16.vlgmr.msra.gmra.mrb[44].mxu0 %vm190_vm1, %v1850_v58  ;;  %v2381_v58 = vsel %vm197_vm0, %v3302_v47, 0  ;;  %v2881_v29 = vrot.slane %v3349_v54, 3 }
  0x6b   : > { %3616 = vmatmul.mubr.msk.bf16.vlgmr.msra.gmra.mrb[44].mxu1 %vm190_vm1, %v1930_v11  ;;  %3620 = vmatpush3.bf16.msra.mxu0 %v2032_v12  ;;  %v3792_v11 = vld [vmem:[%s3856_s25 + $0x70] sm:$0xfc]   ;;  %v3793_v12 = vld [vmem:[%s3856_s25 + $0x78] sm:$0x1f]   ;;  %v2628_v32 = vsel %vm2007_vm3, %v2619_v17, %v2627_v18 }
  0x6c   : > { %3626 = vmatpush3.bf16.msra.mxu1 %v2125_v14  ;;  %3621 = vmatprep.mubr.msk.bf16.mxu0 %vm190_vm1, %v2024_v15  ;;  %v3324_v14 = vld [vmem:[%s4231_s1 + $0x3e] sm:$0x3]  ;;  %v2799_v24 = vshrl.u32 %v3792_v11, 16  ;;  %v2802_v25 = vshll.u32 %v3792_v11, 16  ;;  %v2807_v26 = vshrl.u32 %v3793_v12, 16 }
  0x6d   : > { %3627 = vmatprep.mubr.msk.bf16.mxu1 %vm190_vm1, %v2117_v16  ;;  %3717 = vmatprep.subr.msk.bf16.mxu0 %vm197_vm0, %v3288_v21  ;;  %v2714_v21 = vshrl.u32 %v3791_v9, 16  ;;  %v2636_v30 = vsel %vm197_vm0, %v3324_v14, 0 }
  0x6e   : > { %3718 = vmatprep.subr.msk.bf16.mxu1 %vm197_vm0, %v3297_v27  ;;  %v2810_v27 = vshll.u32 %v3793_v12, 16  ;;  %v2804_v41 = vrot.slane %v2802_v25, 3 }
  0x6f   : > { %v2716_v36 = vrot.slane %v2714_v21, 2 }
  0x72   : > { %3622 = vmatmul.mubr.msk.bf16.vlgmr.msra.gmra.mrb[48].mxu0 %vm190_vm1, %v2023_v62  ;;  %v2525_v62 = vrot.slane %v2523_v51, 3  ;;  %v3352_v51 = vld [vmem:[%s3856_s25 + $0x50] sm:$0x8] }
  0x73   : > { %3628 = vmatmul.mubr.msk.bf16.vlgmr.msra.gmra.mrb[48].mxu1 %vm190_vm1, %v2116_v0  ;;  %3632 = vmatpush3.bf16.msra.mxu0 %v2218_v40  ;;  %v2533_v0 = vrot.slane %v2531_v52, 3  ;;  %v2801_v40 = vrot.slane %v2799_v24, 2  ;;  %v2822_v52 = vsel %vm197_vm0, %v3342_v45, 0  ;;  %v3354_v56 = vcombine.low %v3352_v51, %v4115_v33 }
  0x74   : > { %3638 = vmatpush3.bf16.msra.mxu1 %v2311_v43  ;;  %3633 = vmatprep.mubr.msk.bf16.mxu0 %vm190_vm1, %v2210_v44  ;;  %v2526_v15 = vor.u32 %v2525_v62, %v2522_v61  ;;  %v2809_v43 = vrot.slane %v2807_v26, 2  ;;  %v2812_v44 = vrot.slane %v2810_v27, 3 }
  0x75   : > { %3639 = vmatprep.mubr.msk.bf16.mxu1 %vm190_vm1, %v2303_v46  ;;  %3719 = vmatprep.subr.msk.bf16.mxu0 %vm197_vm0, %v3302_v47  ;;  %v2534_v16 = vor.u32 %v2533_v0, %v2530_v63  ;;  %v2720_v47 = vor.u32 %v2719_v37, %v2716_v36  ;;  %v2805_v48 = vor.u32 %v2804_v41, %v2801_v40  ;;  %v2950_v33 = vrot.slane %v3354_v56, 3 }
  0x76   : > { %3720 = vmatprep.subr.msk.bf16.mxu1 %vm197_vm0, %v3307_v49  ;;  %v2813_v49 = vor.u32 %v2812_v44, %v2809_v43 }
  0x77   : > { %v2952_v63 = vsel %vm2370_vm4, %v2950_v33, %v2951_v59 }
  0x78   : > { %v2814_v6 = vsel %vm2007_vm3, %v2805_v48, %v2813_v49 }
  0x7a   : > { %3634 = vmatmul.mubr.msk.bf16.vlgmr.msra.gmra.mrb[52].mxu0 %vm190_vm1, %v2209_v31  ;;  %v2535_v31 = vsel %vm2007_vm3, %v2526_v15, %v2534_v16 }
  0x7b   : > { %3640 = vmatmul.mubr.msk.bf16.vlgmr.msra.gmra.mrb[52].mxu1 %vm190_vm1, %v2302_v35  ;;  %3644 = vmatpush3.bf16.msra.mxu0 %v2381_v58  ;;  %v2711_v35 = vrot.slane %v2709_v20, 3  ;;  %v2882_v58 = vrot.slane %v4122_v39, 3 }
  0x7c   : > { %3650 = vmatpush3.bf16.msra.mxu1 %v2450_v5  ;;  %3645 = vmatprep.mubr.msk.bf16.mxu0 %vm190_vm1, %v2373_v7 }
  0x7d   : > { %3651 = vmatprep.mubr.msk.bf16.mxu1 %vm190_vm1, %v2442_v22  ;;  %3721 = vmatprep.subr.msk.bf16.mxu0 %vm197_vm0, %v3315_v10  ;;  %v2712_v46 = vor.u32 %v2711_v35, %v2708_v34  ;;  %v2883_v62 = vsel %vm2370_vm4, %v2881_v29, %v2882_v58 }
  0x7e   : > { %3722 = vmatprep.subr.msk.bf16.mxu1 %vm197_vm0, %v3324_v14 }
  0x7f   : > { %v2721_v53 = vsel %vm2007_vm3, %v2712_v46, %v2720_v47 }
  0x82   : > { %3646 = vmatmul.mubr.msk.bf16.vlgmr.msra.gmra.mrb[56].mxu0 %vm190_vm1, %v2372_v57  ;;  %v3353_v57 = vld [vmem:[%s4231_s1 + $0x46] sm:$0x3] }
  0x83   : > { %3652 = vmatmul.mubr.msk.bf16.vlgmr.msra.gmra.mrb[56].mxu1 %vm190_vm1, %v2441_v60  ;;  %3656 = vmatpush3.bf16.msra.mxu0 %v2543_v28  ;;  %v2891_v60 = vsel %vm197_vm0, %v3348_v55, 0  ;;  %v2960_v61 = vsel %vm197_vm0, %v3353_v57, 0 }
  0x84   : > { %3662 = vmatpush3.bf16.msra.mxu1 %v2636_v30  ;;  %3657 = vmatprep.mubr.msk.bf16.mxu0 %vm190_vm1, %v2535_v31 }
  0x85   : > { %3663 = vmatprep.mubr.msk.bf16.mxu1 %vm190_vm1, %v2628_v32  ;;  %3723 = vmatprep.subr.msk.bf16.mxu0 %vm197_vm0, %v3333_v38 }
  0x86   : > { %3724 = vmatprep.subr.msk.bf16.mxu1 %vm197_vm0, %v3342_v45 }
  0x8a   : > { %3658 = vmatmul.mubr.msk.bf16.vlgmr.msra.gmra.mrb[60].mxu0 %vm190_vm1, %v2534_v16 }
  0x8b   : > { %3664 = vmatmul.mubr.msk.bf16.vlgmr.msra.gmra.mrb[60].mxu1 %vm190_vm1, %v2627_v18  ;;  %3668 = vmatpush3.bf16.msra.mxu0 %v2729_v3 }
  0x8c   : > { %3674 = vmatpush3.bf16.msra.mxu1 %v2822_v52  ;;  %3669 = vmatprep.mubr.msk.bf16.mxu0 %vm190_vm1, %v2721_v53 }
  0x8d   : > { %3675 = vmatprep.mubr.msk.bf16.mxu1 %vm190_vm1, %v2814_v6  ;;  %3725 = vmatprep.subr.msk.bf16.mxu0 %vm197_vm0, %v3348_v55 }
  0x8e   : > { %3726 = vmatprep.subr.msk.bf16.mxu1 %vm197_vm0, %v3353_v57 }
  0x92   : > { %3670 = vmatmul.mubr.msk.bf16.vlgmr.msra.gmra.mrb[64].mxu0 %vm190_vm1, %v2720_v47 }
  0x93   : > { %3676 = vmatmul.mubr.msk.bf16.vlgmr.msra.gmra.mrb[64].mxu1 %vm190_vm1, %v2813_v49  ;;  %3680 = vmatpush3.bf16.msra.mxu0 %v2891_v60 }
  0x94   : > { %3686 = vmatpush3.bf16.msra.mxu1 %v2960_v61  ;;  %3681 = vmatprep.mubr.msk.bf16.mxu0 %vm190_vm1, %v2883_v62 }
  0x95   : > { %3687 = vmatprep.mubr.msk.bf16.mxu1 %vm190_vm1, %v2952_v63 }
  0x9a   : > { %3682 = vmatmul.mubr.msk.bf16.vlgmr.msra.gmra.mrb[68].mxu0 %vm190_vm1, %v2882_v58 }
  0x9b   : > { %3688 = vmatmul.mubr.msk.bf16.vlgmr.msra.gmra.mrb[68].mxu1 %vm190_vm1, %v2951_v59 }
  0xe5   : > { %v3479_v39 = vpop.f32.mrb[0].mxu0 }
  0xe6   : > { %v3485_v42 = vpop.f32.mrb[0].mxu1  ;;  %v235_v0 = vpop.f32.mrb[1].mxu0 }
  0xe7   : > { %v309_v1 = vadd.f32 %v3485_v42, %v3479_v39  ;;  %v300_v2 = vpop.f32.mrb[1].mxu1  ;;  %v3480_v4 = vpop.f32.mrb[2].mxu0 }
  0xe8   : > { %v301_v13 = vadd.f32 %v300_v2, %v235_v0  ;;  %v3486_v5 = vpop.f32.mrb[2].mxu1  ;;  %v238_v7 = vpop.f32.mrb[3].mxu0 }
  0xe9   : > { %v303_v8 = vpop.f32.mrb[3].mxu1 }
  0xea   : > { %v304_v9 = vadd.f32 %v303_v8, %v238_v7 }
  0xed   : > { %v3491_v22 = vpop.f32.mrb[4].mxu0 }
  0xee   : > { %v387_v10 = vadd.f32 %v3491_v22, %v309_v1  ;;  %v3497_v11 = vpop.f32.mrb[4].mxu1  ;;  %v371_v12 = vpop.f32.mrb[5].mxu0 }
  0xef   : > { %v385_v14 = vadd.f32 %v371_v12, %v301_v13  ;;  %v445_v15 = vpop.f32.mrb[5].mxu1  ;;  %v3492_v16 = vpop.f32.mrb[6].mxu0 }
  0xf0   : > { %v461_v17 = vadd.f32 %v3497_v11, %v387_v10  ;;  %v3498_v18 = vpop.f32.mrb[6].mxu1  ;;  %v374_v19 = vpop.f32.mrb[7].mxu0 }
  0xf1   : > { %v459_v20 = vadd.f32 %v445_v15, %v385_v14  ;;  %v386_v21 = vadd.f32 %v374_v19, %v304_v9  ;;  %v448_v23 = vpop.f32.mrb[7].mxu1 }
  0xf3   : > { %v460_v24 = vadd.f32 %v448_v23, %v386_v21 }
  0xf5   : > { %v3503_v25 = vpop.f32.mrb[8].mxu0 }
  0xf6   : > { %v542_v26 = vadd.f32 %v3503_v25, %v461_v17  ;;  %v3509_v27 = vpop.f32.mrb[8].mxu1  ;;  %v526_v28 = vpop.f32.mrb[9].mxu0 }
  0xf7   : > { %v540_v30 = vadd.f32 %v526_v28, %v459_v20  ;;  %v606_v31 = vpop.f32.mrb[9].mxu1  ;;  %v3504_v32 = vpop.f32.mrb[10].mxu0 }
  0xf8   : > { %v622_v34 = vadd.f32 %v3509_v27, %v542_v26  ;;  %v3510_v35 = vpop.f32.mrb[10].mxu1  ;;  %v529_v36 = vpop.f32.mrb[11].mxu0 }
  0xf9   : > { %v620_v37 = vadd.f32 %v606_v31, %v540_v30  ;;  %v541_v38 = vadd.f32 %v529_v36, %v460_v24  ;;  %v609_v40 = vpop.f32.mrb[11].mxu1 }
  0xfb   : > { %v621_v41 = vadd.f32 %v609_v40, %v541_v38 }
  0xfd   : > { %v3515_v43 = vpop.f32.mrb[12].mxu0 }
  0xfe   : > { %v696_v44 = vadd.f32 %v3515_v43, %v622_v34  ;;  %v3521_v45 = vpop.f32.mrb[12].mxu1  ;;  %v680_v46 = vpop.f32.mrb[13].mxu0 }
  0xff   : > { %v694_v47 = vadd.f32 %v680_v46, %v620_v37  ;;  %v754_v48 = vpop.f32.mrb[13].mxu1  ;;  %v3516_v49 = vpop.f32.mrb[14].mxu0 }
 0x100   : > { %v770_v50 = vadd.f32 %v3521_v45, %v696_v44  ;;  %v3522_v51 = vpop.f32.mrb[14].mxu1  ;;  %v683_v3 = vpop.f32.mrb[15].mxu0 }
 0x101   : > { %v768_v52 = vadd.f32 %v754_v48, %v694_v47  ;;  %v695_v53 = vadd.f32 %v683_v3, %v621_v41  ;;  %v757_v54 = vpop.f32.mrb[15].mxu1 }
 0x103   : > { %v769_v6 = vadd.f32 %v757_v54, %v695_v53 }
 0x105   : > { %v3527_v55 = vpop.f32.mrb[16].mxu0 }
 0x106   : > { %v844_v56 = vadd.f32 %v3527_v55, %v770_v50  ;;  %v3533_v57 = vpop.f32.mrb[16].mxu1  ;;  %v828_v29 = vpop.f32.mrb[17].mxu0 }
 0x107   : > { %v842_v58 = vadd.f32 %v828_v29, %v768_v52  ;;  %v902_v33 = vpop.f32.mrb[17].mxu1  ;;  %v3528_v59 = vpop.f32.mrb[18].mxu0 }
 0x108   : > { %v918_v60 = vadd.f32 %v3533_v57, %v844_v56  ;;  %v3534_v61 = vpop.f32.mrb[18].mxu1  ;;  %v831_v62 = vpop.f32.mrb[19].mxu0 }
 0x109   : > { %v916_v63 = vadd.f32 %v902_v33, %v842_v58  ;;  %v843_v39 = vadd.f32 %v831_v62, %v769_v6  ;;  %v905_v42 = vpop.f32.mrb[19].mxu1 }
 0x10b   : > { %v917_v0 = vadd.f32 %v905_v42, %v843_v39 }
 0x10d   : > { %v3539_v1 = vpop.f32.mrb[20].mxu0 }
 0x10e   : > { %v998_v2 = vadd.f32 %v3539_v1, %v918_v60  ;;  %v3545_v4 = vpop.f32.mrb[20].mxu1  ;;  %v982_v13 = vpop.f32.mrb[21].mxu0 }
 0x10f   : > { %v996_v5 = vadd.f32 %v982_v13, %v916_v63  ;;  %v1062_v7 = vpop.f32.mrb[21].mxu1  ;;  %v3540_v8 = vpop.f32.mrb[22].mxu0 }
 0x110   : > { %v1078_v9 = vadd.f32 %v3545_v4, %v998_v2  ;;  %v3546_v22 = vpop.f32.mrb[22].mxu1  ;;  %v985_v10 = vpop.f32.mrb[23].mxu0 }
 0x111   : > { %v1076_v11 = vadd.f32 %v1062_v7, %v996_v5  ;;  %v997_v12 = vadd.f32 %v985_v10, %v917_v0  ;;  %v1065_v14 = vpop.f32.mrb[23].mxu1 }
 0x113   : > { %v1077_v15 = vadd.f32 %v1065_v14, %v997_v12 }
 0x115   : > { %v3551_v16 = vpop.f32.mrb[24].mxu0 }
 0x116   : > { %v1152_v17 = vadd.f32 %v3551_v16, %v1078_v9  ;;  %v3557_v18 = vpop.f32.mrb[24].mxu1  ;;  %v1136_v19 = vpop.f32.mrb[25].mxu0 }
 0x117   : > { %v1150_v20 = vadd.f32 %v1136_v19, %v1076_v11  ;;  %v1210_v21 = vpop.f32.mrb[25].mxu1  ;;  %v3552_v23 = vpop.f32.mrb[26].mxu0 }
 0x118   : > { %v1226_v24 = vadd.f32 %v3557_v18, %v1152_v17  ;;  %v3558_v25 = vpop.f32.mrb[26].mxu1  ;;  %v1139_v26 = vpop.f32.mrb[27].mxu0 }
 0x119   : > { %v1224_v27 = vadd.f32 %v1210_v21, %v1150_v20  ;;  %v1151_v28 = vadd.f32 %v1139_v26, %v1077_v15  ;;  %v1213_v30 = vpop.f32.mrb[27].mxu1 }
 0x11b   : > { %v1225_v31 = vadd.f32 %v1213_v30, %v1151_v28 }
 0x11d   : > { %v3563_v32 = vpop.f32.mrb[28].mxu0 }
 0x11e   : > { %v1300_v34 = vadd.f32 %v3563_v32, %v1226_v24  ;;  %v3569_v35 = vpop.f32.mrb[28].mxu1  ;;  %v1284_v36 = vpop.f32.mrb[29].mxu0 }
 0x11f   : > { %v1298_v37 = vadd.f32 %v1284_v36, %v1224_v27  ;;  %v1358_v38 = vpop.f32.mrb[29].mxu1  ;;  %v3564_v40 = vpop.f32.mrb[30].mxu0 }
 0x120   : > { %v1374_v41 = vadd.f32 %v3569_v35, %v1300_v34  ;;  %v3570_v43 = vpop.f32.mrb[30].mxu1  ;;  %v1287_v44 = vpop.f32.mrb[31].mxu0 }
 0x121   : > { %v1372_v45 = vadd.f32 %v1358_v38, %v1298_v37  ;;  %v1299_v46 = vadd.f32 %v1287_v44, %v1225_v31  ;;  %v1361_v47 = vpop.f32.mrb[31].mxu1 }
 0x123   : > { %v1373_v48 = vadd.f32 %v1361_v47, %v1299_v46 }
 0x125   : > { %v3575_v49 = vpop.f32.mrb[32].mxu0 }
 0x126   : > { %v1454_v50 = vadd.f32 %v3575_v49, %v1374_v41  ;;  %v3581_v51 = vpop.f32.mrb[32].mxu1  ;;  %v1438_v3 = vpop.f32.mrb[33].mxu0 }
 0x127   : > { %v1452_v52 = vadd.f32 %v1438_v3, %v1372_v45  ;;  %v1518_v53 = vpop.f32.mrb[33].mxu1  ;;  %v3576_v54 = vpop.f32.mrb[34].mxu0 }
 0x128   : > { %v1534_v6 = vadd.f32 %v3581_v51, %v1454_v50  ;;  %v3582_v55 = vpop.f32.mrb[34].mxu1  ;;  %v1441_v56 = vpop.f32.mrb[35].mxu0 }
 0x129   : > { %v1532_v57 = vadd.f32 %v1518_v53, %v1452_v52  ;;  %v1453_v29 = vadd.f32 %v1441_v56, %v1373_v48  ;;  %v1521_v58 = vpop.f32.mrb[35].mxu1 }
 0x12b   : > { %v1533_v33 = vadd.f32 %v1521_v58, %v1453_v29 }
 0x12d   : > { %v3587_v59 = vpop.f32.mrb[36].mxu0 }
 0x12e   : > { %v1608_v60 = vadd.f32 %v3587_v59, %v1534_v6  ;;  %v3593_v61 = vpop.f32.mrb[36].mxu1  ;;  %v1592_v62 = vpop.f32.mrb[37].mxu0 }
 0x12f   : > { %v1606_v63 = vadd.f32 %v1592_v62, %v1532_v57  ;;  %v1666_v39 = vpop.f32.mrb[37].mxu1  ;;  %v3588_v42 = vpop.f32.mrb[38].mxu0 }
 0x130   : > { %v1682_v0 = vadd.f32 %v3593_v61, %v1608_v60  ;;  %v3594_v1 = vpop.f32.mrb[38].mxu1  ;;  %v1595_v2 = vpop.f32.mrb[39].mxu0 }
 0x131   : > { %v1680_v4 = vadd.f32 %v1666_v39, %v1606_v63  ;;  %v1607_v13 = vadd.f32 %v1595_v2, %v1533_v33  ;;  %v1669_v5 = vpop.f32.mrb[39].mxu1 }
 0x133   : > { %v1681_v7 = vadd.f32 %v1669_v5, %v1607_v13 }
 0x135   : > { %v3599_v8 = vpop.f32.mrb[40].mxu0 }
 0x136   : > { %v1756_v9 = vadd.f32 %v3599_v8, %v1682_v0  ;;  %v3605_v22 = vpop.f32.mrb[40].mxu1  ;;  %v1740_v10 = vpop.f32.mrb[41].mxu0 }
 0x137   : > { %v1754_v11 = vadd.f32 %v1740_v10, %v1680_v4  ;;  %v1814_v12 = vpop.f32.mrb[41].mxu1  ;;  %v3600_v14 = vpop.f32.mrb[42].mxu0 }
 0x138   : > { %v1830_v15 = vadd.f32 %v3605_v22, %v1756_v9  ;;  %v3606_v16 = vpop.f32.mrb[42].mxu1  ;;  %v1743_v17 = vpop.f32.mrb[43].mxu0 }
 0x139   : > { %v1828_v18 = vadd.f32 %v1814_v12, %v1754_v11  ;;  %v1755_v19 = vadd.f32 %v1743_v17, %v1681_v7  ;;  %v1817_v20 = vpop.f32.mrb[43].mxu1 }
 0x13b   : > { %v1829_v21 = vadd.f32 %v1817_v20, %v1755_v19 }
 0x13d   : > { %v3611_v23 = vpop.f32.mrb[44].mxu0 }
 0x13e   : > { %v1910_v24 = vadd.f32 %v3611_v23, %v1830_v15  ;;  %v3617_v25 = vpop.f32.mrb[44].mxu1  ;;  %v1894_v26 = vpop.f32.mrb[45].mxu0 }
 0x13f   : > { %v1908_v27 = vadd.f32 %v1894_v26, %v1828_v18  ;;  %v1974_v28 = vpop.f32.mrb[45].mxu1  ;;  %v3612_v30 = vpop.f32.mrb[46].mxu0 }
 0x140   : > { %v1990_v31 = vadd.f32 %v3617_v25, %v1910_v24  ;;  %v3618_v32 = vpop.f32.mrb[46].mxu1  ;;  %v1897_v34 = vpop.f32.mrb[47].mxu0 }
 0x141   : > { %v1988_v35 = vadd.f32 %v1974_v28, %v1908_v27  ;;  %v1909_v36 = vadd.f32 %v1897_v34, %v1829_v21  ;;  %v1977_v37 = vpop.f32.mrb[47].mxu1 }
 0x143   : > { %v1989_v38 = vadd.f32 %v1977_v37, %v1909_v36 }
 0x145   : > { %v3623_v40 = vpop.f32.mrb[48].mxu0 }
 0x146   : > { %v2084_v41 = vadd.f32 %v3623_v40, %v1990_v31  ;;  %v3629_v43 = vpop.f32.mrb[48].mxu1  ;;  %v2068_v44 = vpop.f32.mrb[49].mxu0 }
 0x147   : > { %v2082_v45 = vadd.f32 %v2068_v44, %v1988_v35  ;;  %v2161_v46 = vpop.f32.mrb[49].mxu1  ;;  %v3624_v47 = vpop.f32.mrb[50].mxu0 }
 0x148   : > { %v2177_v48 = vadd.f32 %v3629_v43, %v2084_v41  ;;  %v3630_v49 = vpop.f32.mrb[50].mxu1  ;;  %v2071_v50 = vpop.f32.mrb[51].mxu0 }
 0x149   : > { %v2175_v51 = vadd.f32 %v2161_v46, %v2082_v45  ;;  %v2083_v3 = vadd.f32 %v2071_v50, %v1989_v38  ;;  %v2164_v52 = vpop.f32.mrb[51].mxu1 }
 0x14b   : > { %v2176_v53 = vadd.f32 %v2164_v52, %v2083_v3 }
 0x14d   : > { %v3635_v54 = vpop.f32.mrb[52].mxu0 }
 0x14e   : > { %v2270_v6 = vadd.f32 %v3635_v54, %v2177_v48  ;;  %v3641_v55 = vpop.f32.mrb[52].mxu1  ;;  %v2254_v56 = vpop.f32.mrb[53].mxu0 }
 0x14f   : > { %v2268_v57 = vadd.f32 %v2254_v56, %v2175_v51  ;;  %v2347_v29 = vpop.f32.mrb[53].mxu1  ;;  %v3636_v58 = vpop.f32.mrb[54].mxu0  ;;  %v3357_v51 = vld [vmem:[%s4232_s2] ss:$0 sm:$0xff] }
 0x150   : > { %v2363_v33 = vadd.f32 %v3641_v55, %v2270_v6  ;;  %v3642_v59 = vpop.f32.mrb[54].mxu1  ;;  %v2257_v60 = vpop.f32.mrb[55].mxu0 }
 0x151   : > { %v2361_v61 = vadd.f32 %v2347_v29, %v2268_v57  ;;  %v2269_v62 = vadd.f32 %v2257_v60, %v2176_v53  ;;  %v2350_v63 = vpop.f32.mrb[55].mxu1 }
 0x153   : > { %v2362_v39 = vadd.f32 %v2350_v63, %v2269_v62 }
 0x155   : > { %v3647_v42 = vpop.f32.mrb[56].mxu0 }
 0x156   : > { %v2433_v0 = vadd.f32 %v3647_v42, %v2363_v33  ;;  %v3653_v1 = vpop.f32.mrb[56].mxu1  ;;  %v2417_v2 = vpop.f32.mrb[57].mxu0 }
 0x157   : > { %v2431_v4 = vadd.f32 %v2417_v2, %v2361_v61  ;;  %v2486_v13 = vpop.f32.mrb[57].mxu1  ;;  %v3648_v5 = vpop.f32.mrb[58].mxu0 }
 0x158   : > { %v2502_v7 = vadd.f32 %v3653_v1, %v2433_v0  ;;  %v3654_v8 = vpop.f32.mrb[58].mxu1  ;;  %v2420_v9 = vpop.f32.mrb[59].mxu0 }
 0x159   : > { %v2500_v22 = vadd.f32 %v2486_v13, %v2431_v4  ;;  %v2432_v10 = vadd.f32 %v2420_v9, %v2362_v39  ;;  %v2489_v11 = vpop.f32.mrb[59].mxu1 }
 0x15b   : > { %v2501_v12 = vadd.f32 %v2489_v11, %v2432_v10 }
 0x15d   : > { %v3659_v14 = vpop.f32.mrb[60].mxu0 }
 0x15e   : > { %v2595_v15 = vadd.f32 %v3659_v14, %v2502_v7  ;;  %v3665_v16 = vpop.f32.mrb[60].mxu1  ;;  %v2579_v17 = vpop.f32.mrb[61].mxu0 }
 0x15f   : > { %v2593_v18 = vadd.f32 %v2579_v17, %v2500_v22  ;;  %v2672_v19 = vpop.f32.mrb[61].mxu1  ;;  %v3660_v20 = vpop.f32.mrb[62].mxu0 }
 0x160   : > { %v2688_v21 = vadd.f32 %v3665_v16, %v2595_v15  ;;  %v3666_v23 = vpop.f32.mrb[62].mxu1  ;;  %v2582_v24 = vpop.f32.mrb[63].mxu0 }
 0x161   : > { %v2686_v25 = vadd.f32 %v2672_v19, %v2593_v18  ;;  %v2594_v26 = vadd.f32 %v2582_v24, %v2501_v12  ;;  %v2675_v27 = vpop.f32.mrb[63].mxu1 }
 0x163   : > { %v2687_v28 = vadd.f32 %v2675_v27, %v2594_v26 }
 0x165   : > { %v3671_v30 = vpop.f32.mrb[64].mxu0 }
 0x166   : > { %v2781_v31 = vadd.f32 %v3671_v30, %v2688_v21  ;;  %v3677_v32 = vpop.f32.mrb[64].mxu1  ;;  %v2765_v34 = vpop.f32.mrb[65].mxu0 }
 0x167   : > { %v2779_v35 = vadd.f32 %v2765_v34, %v2686_v25  ;;  %v2858_v36 = vpop.f32.mrb[65].mxu1  ;;  %v3672_v37 = vpop.f32.mrb[66].mxu0 }
 0x168   : > { %v2874_v38 = vadd.f32 %v3677_v32, %v2781_v31  ;;  %v3678_v40 = vpop.f32.mrb[66].mxu1  ;;  %v2768_v41 = vpop.f32.mrb[67].mxu0 }
 0x169   : > { %v2872_v43 = vadd.f32 %v2858_v36, %v2779_v35  ;;  %v2780_v44 = vadd.f32 %v2768_v41, %v2687_v28  ;;  %v2861_v45 = vpop.f32.mrb[67].mxu1 }
 0x16b   : > { %v2873_v46 = vadd.f32 %v2861_v45, %v2780_v44 }
 0x16d   : > { %v3683_v47 = vpop.f32.mrb[68].mxu0 }
 0x16e   : > { %v2943_v48 = vadd.f32 %v3683_v47, %v2874_v38  ;;  %v3689_v49 = vpop.f32.mrb[68].mxu1  ;;  %v2927_v50 = vpop.f32.mrb[69].mxu0 }
 0x16f   : > { %v2941_v3 = vadd.f32 %v2927_v50, %v2872_v43  ;;  %v2996_v52 = vpop.f32.mrb[69].mxu1  ;;  %v3684_v53 = vpop.f32.mrb[70].mxu0 }
 0x170   : > { %v3012_v54 = vadd.f32 %v3689_v49, %v2943_v48  ;;  %v3690_v6 = vpop.f32.mrb[70].mxu1  ;;  %v2930_v55 = vpop.f32.mrb[71].mxu0 }
 0x171   : > { %v3010_v56 = vadd.f32 %v2996_v52, %v2941_v3  ;;  %v2942_v57 = vadd.f32 %v2930_v55, %v2873_v46  ;;  %v2999_v29 = vpop.f32.mrb[71].mxu1 }
 0x172   : > { %v3022_v58 = vadd.f32 %v3357_v51, %v3012_v54 }
 0x173   : > { %v3020_v33 = vadd.f32 %v3357_v51, %v3010_v56  ;;  %v3011_v59 = vadd.f32 %v2999_v29, %v2942_v57 }
 0x174   : > { %v3025_v60 = vmax.f32 %v3022_v58, 0.0 }
 0x175   : > { %v3023_v61 = vmax.f32 %v3020_v33, 0.0  ;;  %v3021_v62 = vadd.f32 %v3357_v51, %v3011_v59 }
 0x176   : > { %v3366_v63 = vpack.c.bf16 %v3025_v60, %v3025_v60 }
 0x177   : > { %v3364_v39 = vpack.c.bf16 %v3023_v61, %v3023_v61  ;;  %v3024_v42 = vmax.f32 %v3021_v62, 0.0 }
 0x178   : > { %3043 = vst.msk [vmem:[%s170_s21 + $0x8] sm:$0x3] %vm3042_vm5, %v3366_v63 }
 0x179   : > { %3040 = vst.msk [vmem:[%s170_s21] sm:$0xf] %vm3039_vm6, %v3364_v39  ;;  %v3365_v0 = vpack.c.bf16 %v3024_v42, %v3024_v42 }
 0x17b   : > { %3041 = vst.msk [vmem:[%s170_s21 + $0x4] sm:$0xf] %vm3039_vm6, %v3365_v0 }
 0x17c PF: > { %s13_s12 = sadd.s32 1, %s3802_s12  }
 0x17d   : > { %p10_p4 = scmp.ge.s32.totalorder %s13_s12, 4  }
 0x17f   :  { %12 = sbr.rel (!%p10_p4) target bundleno = 1 (0x1), region = 112 }

</bundles_post_ra>
